<compile_context>
chip_gen: v6e
topology: v6e:2x2x1
jax: 0.10.0
libtpu: 0.0.40
codegen_flags: <defaults>
</compile_context>

<pallas_src>
import functools
import math

import jax
import jax.numpy as jnp
from jax.experimental import pallas as pl
from jax.experimental.pallas import tpu as pltpu

EPS = 1e-5


# ---------------------------- kernel 1: prepool -------------------------------

def prepool_kernel(BB, N_pad, N_real,
                   pts_ref,
                   w1, b1, w2, b2, w3, b3, w4, b4, w5, b5,
                   pooled_ref):
    M = BB * N_pad
    need_mask = (N_real != N_pad)
    if need_mask:
        # (1, N_pad, 1) boolean mask of real points (broadcast over batch & lanes)
        mask3 = jax.lax.broadcasted_iota(jnp.int32, (1, N_pad, 1), 1) < N_real
    inv_n = 1.0 / N_real

    def layer(h2, w_ref, b_ref):
        # pointwise Conv1d(k=1) == dense matmul over channels.
        # Operands follow the weight dtype (bf16 for the wide layers), f32 accum.
        w = w_ref[...]
        h2 = jnp.dot(h2.astype(w.dtype), w,
                     preferred_element_type=jnp.float32) + b_ref[...]
        C = h2.shape[-1]
        # InstanceNorm1d (biased var, no affine): per-batch-element stats over the
        # N points via reshape + sublane reductions (VPU/XLU), all in f32.
        h3 = h2.reshape(BB, N_pad, C)
        hm3 = jnp.where(mask3, h3, 0.0) if need_mask else h3
        mean = jnp.sum(hm3, axis=1, keepdims=True) * inv_n            # (BB,1,C)
        msq = jnp.sum(hm3 * hm3, axis=1, keepdims=True) * inv_n       # (BB,1,C)
        var = jnp.maximum(msq - mean * mean, 0.0)
        scale = jax.lax.rsqrt(var + EPS)
        h3 = jnp.maximum((h3 - mean) * scale, 0.0)                    # IN + ReLU
        return h3.reshape(M, C)

    # (M, 4) input is lane-sparse but tiny; first conv's K=4 contraction is
    # negligible work, so hoisting it to XLA was skipped per review ("accept it").
    h = pts_ref[...]
    h = layer(h, w1, b1)
    h = layer(h, w2, b2)
    h = layer(h, w3, b3)
    h = layer(h, w4, b4)
    h = layer(h, w5, b5)                                              # (M, 1024)

    # AdaptiveMaxPool1d(1): max over the points of each batch element.
    h3 = h.reshape(BB, N_pad, h.shape[-1])
    if need_mask:
        h3 = jnp.where(mask3, h3, 0.0)   # exact: ReLU output is >= 0
    pooled_ref[...] = jnp.max(h3, axis=1)                             # (BB, 1024)


# ---------------------------- kernel 2: postpool -------------------------------

def postpool_kernel(G, pooled_ref,
                    l1, lb1, g1, be1,
                    l2, lb2, g2, be2,
                    l3, lb3,
                    raw_ref):
    def gn_relu(y, gamma, beta):
        # GroupNorm via reshape (B, G, C/G) + lane reductions (no MXU, f32 stats).
        Bb, C = y.shape
        gs = C // G
        y3 = y.reshape(Bb, G, gs)
        mean = jnp.mean(y3, axis=2, keepdims=True)
        c = y3 - mean
        var = jnp.mean(c * c, axis=2, keepdims=True)
        yn = (c * jax.lax.rsqrt(var + EPS)).reshape(Bb, C)
        return jnp.maximum(yn * gamma + beta, 0.0)

    y = jnp.dot(pooled_ref[...].astype(jnp.bfloat16), l1[...],
                preferred_element_type=jnp.float32) + lb1[...]
    y = gn_relu(y, g1[...], be1[...])
    y = jnp.dot(y.astype(jnp.bfloat16), l2[...],
                preferred_element_type=jnp.float32) + lb2[...]
    y = gn_relu(y, g2[...], be2[...])
    raw_ref[...] = jnp.dot(y.astype(jnp.bfloat16), l3[...],
                           preferred_element_type=jnp.float32) + lb3[...]


# --------------------------------- wrapper -----------------------------------

def _const_spec(a):
    return pl.BlockSpec(a.shape, lambda i, _nd=a.ndim: (0,) * _nd)


def _choose_bb(B, N_pad):
    """Batch elements per grid step.

    Targets >=256 matmul rows (fills the MXU on v6e/v7x), caps the per-step point
    count so the ~1024-wide working set stays inside VMEM even on v7x (64 MiB),
    keeps BB a multiple of 8 (clean sublane tiles) or the full batch, and prefers
    >=2 grid steps so the "parallel" axis can shard across v7x's 2 TensorCores.
    """
    cands = sorted({d for d in range(8, B + 1, 8) if B % d == 0} | {B})
    cap = 2048  # points per step (~tens of MiB working set incl. bf16 copies)
    feasible = [d for d in cands if d * N_pad <= cap] or [cands[0]]
    good = [d for d in feasible if d * N_pad >= 256]
    bb = min(good) if good else max(feasible)
    if B // bb < 2:
        alt = [d for d in feasible if B // d >= 2]
        if alt:
            bb = max(alt)
    return bb


def parameter_prediction_forward(src, ref_pts, params):
    """src: (B, J, 3), ref_pts: (B, K, 3). Returns (beta, alpha), each (B,)."""
    B, J, _ = src.shape
    K = ref_pts.shape[1]
    N = J + K
    N_pad = -(-N // 8) * 8

    (w1, b1, w2, b2, w3, b3, w4, b4, w5, b5,
     l1, lb1, g1, be1,
     l2, lb2, g2, be2,
     l3, lb3) = params
    out_dim = l3.shape[1]

    # glue: pad 4th channel (src -> 0, ref -> 1), concat along points, and zero-pad
    # the point axis to a multiple of 8 (padded points are masked inside the kernel)
    src_p = jnp.pad(src, ((0, 0), (0, 0), (0, 1)), constant_values=0.0)
    ref_p = jnp.pad(ref_pts, ((0, 0), (0, 0), (0, 1)), constant_values=1.0)
    pts = jnp.concatenate([src_p, ref_p], axis=1)                     # (B, N, 4)
    if N_pad != N:
        pts = jnp.pad(pts, ((0, 0), (0, N_pad - N), (0, 0)))
    pts_flat = pts.reshape(B * N_pad, 4)

    # Zero-pad 64-wide hidden layers to 128 lanes; cast wide conv weights to bf16
    # (first conv kept f32 — K=4 contraction is negligible and keeps pts exact).
    bf = jnp.bfloat16
    w1p = jnp.pad(w1, ((0, 0), (0, 64)))
    b1p = jnp.pad(b1, ((0, 0), (0, 64)))
    w2p = jnp.pad(w2, ((0, 64), (0, 64))).astype(bf)
    b2p = jnp.pad(b2, ((0, 0), (0, 64)))
    w3p = jnp.pad(w3, ((0, 64), (0, 64))).astype(bf)
    b3p = jnp.pad(b3, ((0, 0), (0, 64)))
    w4p = jnp.pad(w4, ((0, 64), (0, 0))).astype(bf)
    w5b = w5.astype(bf)
    conv_params = [w1p, b1p, w2p, b2p, w3p, b3p, w4p, b4, w5b, b5]

    BB = _choose_bb(B, N_pad)

    # ---- kernel 1: prepool conv stack + max-pool, BB batch elements / step ----
    pooled = pl.pallas_call(
        functools.partial(prepool_kernel, BB, N_pad, N),
        out_shape=jax.ShapeDtypeStruct((B, 1024), jnp.float32),
        grid_spec=pltpu.PrefetchScalarGridSpec(
            num_scalar_prefetch=0,
            grid=(B // BB,),
            in_specs=[pl.BlockSpec((BB * N_pad, 4), lambda i: (i, 0))]
                     + [_const_spec(a) for a in conv_params],
            out_specs=pl.BlockSpec((BB, 1024), lambda i: (i, 0))),
        compiler_params=pltpu.CompilerParams(
            dimension_semantics=("parallel",),
            vmem_limit_bytes=48 * 1024 * 1024),   # safe on v7x's 64 MiB VMEM
    )(pts_flat, *conv_params)

    # ---- kernel 2: post-pool MLP, whole batch in one step, bf16 weights ----
    out_pad = -(-out_dim // 128) * 128            # lane-dense raw output width
    l3p = jnp.pad(l3, ((0, 0), (0, out_pad - out_dim))).astype(bf)
    lb3p = jnp.pad(lb3, ((0, 0), (0, out_pad - out_dim)))
    mlp_params = [l1.astype(bf), lb1, g1, be1,
                  l2.astype(bf), lb2, g2, be2,
                  l3p, lb3p]

    raw = pl.pallas_call(
        functools.partial(postpool_kernel, 16),
        out_shape=jax.ShapeDtypeStruct((B, out_pad), jnp.float32),
        grid_spec=pltpu.PrefetchScalarGridSpec(
            num_scalar_prefetch=0,
            grid=(1,),
            in_specs=[_const_spec(pooled)] + [_const_spec(a) for a in mlp_params],
            out_specs=pl.BlockSpec((B, out_pad), lambda i: (0, 0))),
        compiler_params=pltpu.CompilerParams(
            dimension_semantics=("arbitrary",)),
    )(pooled, *mlp_params)

    # softplus + beta/alpha slicing in the wrapper (kernel emits one lane-dense slab)
    sp = jax.nn.softplus(raw[:, :2])
    return sp[:, 0], sp[:, 1]


# ------------------------------ params / reference ----------------------------

def init_params(key, weights_dim=(3,)):
    out_dim = 2 + math.prod(weights_dim)
    conv_dims = [(4, 64), (64, 64), (64, 64), (64, 128), (128, 1024)]
    keys = jax.random.split(key, 16)
    ki = iter(keys)
    params = []
    # prepool conv (kernel_size=1) weights as (Cin, Cout), biases as (1, Cout)
    for cin, cout in conv_dims:
        params.append(0.1 * jax.random.normal(next(ki), (cin, cout), jnp.float32))
        params.append(0.1 * jax.random.normal(next(ki), (1, cout), jnp.float32))
    # postpool: Linear(1024,512) + GroupNorm(16,512)
    params.append(0.05 * jax.random.normal(next(ki), (1024, 512), jnp.float32))
    params.append(0.05 * jax.random.normal(next(ki), (1, 512), jnp.float32))
    params.append(jnp.ones((1, 512), jnp.float32))    # GroupNorm weight (PyTorch init)
    params.append(jnp.zeros((1, 512), jnp.float32))   # GroupNorm bias
    # Linear(512,256) + GroupNorm(16,256)
    params.append(0.05 * jax.random.normal(next(ki), (512, 256), jnp.float32))
    params.append(0.05 * jax.random.normal(next(ki), (1, 256), jnp.float32))
    params.append(jnp.ones((1, 256), jnp.float32))
    params.append(jnp.zeros((1, 256), jnp.float32))
    # Linear(256, 2 + prod(weights_dim))
    params.append(0.05 * jax.random.normal(next(ki), (256, out_dim), jnp.float32))
    params.append(0.05 * jax.random.normal(next(ki), (1, out_dim), jnp.float32))
    return tuple(params)


def reference_forward(src, ref_pts, params):
    """Pure-JAX f32 reference matching the PyTorch forward pass."""
    (w1, b1, w2, b2, w3, b3, w4, b4, w5, b5,
     l1, lb1, g1, be1,
     l2, lb2, g2, be2,
     l3, lb3) = params

    src_p = jnp.pad(src, ((0, 0), (0, 0), (0, 1)), constant_values=0.0)
    ref_p = jnp.pad(ref_pts, ((0, 0), (0, 0), (0, 1)), constant_values=1.0)
    pts = jnp.concatenate([src_p, ref_p], axis=1)    # (B, N, 4)

    def conv_in_relu(h, w, b):
        h = h @ w + b                                  # (B, N, C)
        mean = jnp.mean(h, axis=1, keepdims=True)
        var = jnp.mean((h - mean) ** 2, axis=1, keepdims=True)
        return jnp.maximum((h - mean) / jnp.sqrt(var + EPS), 0.0)

    h = conv_in_relu(pts, w1, b1)
    h = conv_in_relu(h, w2, b2)
    h = conv_in_relu(h, w3, b3)
    h = conv_in_relu(h, w4, b4)
    h = conv_in_relu(h, w5, b5)
    pooled = jnp.max(h, axis=1)                        # (B, 1024)

    def gn_relu(y, gamma, beta, G):
        B, C = y.shape
        gs = C // G
        yr = y.reshape(B, G, gs)
        mean = jnp.mean(yr, axis=2, keepdims=True)
        var = jnp.mean((yr - mean) ** 2, axis=2, keepdims=True)
        yn = ((yr - mean) / jnp.sqrt(var + EPS)).reshape(B, C)
        return jnp.maximum(yn * gamma + beta, 0.0)

    y = pooled @ l1 + lb1
    y = gn_relu(y, g1, be1, 16)
    y = y @ l2 + lb2
    y = gn_relu(y, g2, be2, 16)
    raw = y @ l3 + lb3
    return jax.nn.softplus(raw[:, 0]), jax.nn.softplus(raw[:, 1])


# ----------------------------------- main -------------------------------------

if __name__ == "__main__":
    key = jax.random.PRNGKey(0)
    kp, ks, kr = jax.random.split(key, 3)
    params = init_params(kp, weights_dim=(3,))

    # bf16 matmul operands (f32 accumulation) => parity vs the f32 reference is
    # checked at a correspondingly looser tolerance.
    TOL = 5e-2

    # Case 1: N = J + K already a multiple of 8 (no point padding).
    B, J, K = 2, 8, 8
    src = jax.random.normal(ks, (B, J, 3), jnp.float32)
    ref_pts = jax.random.normal(kr, (B, K, 3), jnp.float32)
    beta, alpha = parameter_prediction_forward(src, ref_pts, params)
    jax.block_until_ready((beta, alpha))
    beta_ref, alpha_ref = reference_forward(src, ref_pts, params)
    assert beta.shape == (B,) and alpha.shape == (B,)
    assert bool(jnp.all(jnp.isfinite(beta))) and bool(jnp.all(jnp.isfinite(alpha)))
    assert jnp.allclose(beta, beta_ref, atol=TOL, rtol=TOL)
    assert jnp.allclose(alpha, alpha_ref, atol=TOL, rtol=TOL)

    # Case 2: ragged point count (N = 11 -> padded to 16) exercises the masked path.
    J2, K2 = 5, 6
    src2 = jax.random.normal(jax.random.fold_in(ks, 1), (B, J2, 3), jnp.float32)
    ref2 = jax.random.normal(jax.random.fold_in(kr, 1), (B, K2, 3), jnp.float32)
    beta2, alpha2 = parameter_prediction_forward(src2, ref2, params)
    jax.block_until_ready((beta2, alpha2))
    beta2_ref, alpha2_ref = reference_forward(src2, ref2, params)
    assert jnp.allclose(beta2, beta2_ref, atol=TOL, rtol=TOL)
    assert jnp.allclose(alpha2, alpha2_ref, atol=TOL, rtol=TOL)

    print("KERNEL_OK")
</pallas_src>

<mosaic_0001>
module attributes {stable_mosaic.version = 11 : i64} {
  func.func @prepool_kernel(%arg0: i32, %arg1: memref<32x4xf32, #tpu.memory_space<vmem>>, %arg2: memref<4x128xf32, #tpu.memory_space<vmem>>, %arg3: memref<1x128xf32, #tpu.memory_space<vmem>>, %arg4: memref<128x128xbf16, #tpu.memory_space<vmem>>, %arg5: memref<1x128xf32, #tpu.memory_space<vmem>>, %arg6: memref<128x128xbf16, #tpu.memory_space<vmem>>, %arg7: memref<1x128xf32, #tpu.memory_space<vmem>>, %arg8: memref<128x128xbf16, #tpu.memory_space<vmem>>, %arg9: memref<1x128xf32, #tpu.memory_space<vmem>>, %arg10: memref<128x1024xbf16, #tpu.memory_space<vmem>>, %arg11: memref<1x1024xf32, #tpu.memory_space<vmem>>, %arg12: memref<2x1024xf32, #tpu.memory_space<vmem>>) attributes {dimension_semantics = [#tpu.dimension_semantics<parallel>], iteration_bounds = array<i64: 1>, scalar_prefetch = 0 : i64, scratch_operands = 0 : i64, tpu.core_type = #tpu.core_type<tc>, window_params = [{transform_indices = @transform_0, window_bounds = array<i64: 32, 4>}, {pipeline_mode = #tpu.pipeline_mode<synchronous>, transform_indices = @transform_1, window_bounds = array<i64: 4, 128>}, {pipeline_mode = #tpu.pipeline_mode<synchronous>, transform_indices = @transform_2, window_bounds = array<i64: 1, 128>}, {pipeline_mode = #tpu.pipeline_mode<synchronous>, transform_indices = @transform_3, window_bounds = array<i64: 128, 128>}, {pipeline_mode = #tpu.pipeline_mode<synchronous>, transform_indices = @transform_4, window_bounds = array<i64: 1, 128>}, {pipeline_mode = #tpu.pipeline_mode<synchronous>, transform_indices = @transform_5, window_bounds = array<i64: 128, 128>}, {pipeline_mode = #tpu.pipeline_mode<synchronous>, transform_indices = @transform_6, window_bounds = array<i64: 1, 128>}, {pipeline_mode = #tpu.pipeline_mode<synchronous>, transform_indices = @transform_7, window_bounds = array<i64: 128, 128>}, {pipeline_mode = #tpu.pipeline_mode<synchronous>, transform_indices = @transform_8, window_bounds = array<i64: 1, 128>}, {pipeline_mode = #tpu.pipeline_mode<synchronous>, transform_indices = @transform_9, window_bounds = array<i64: 128, 1024>}, {pipeline_mode = #tpu.pipeline_mode<synchronous>, transform_indices = @transform_10, window_bounds = array<i64: 1, 1024>}, {transform_indices = @transform_11, window_bounds = array<i64: 2, 1024>}]} {
    %c0 = arith.constant 0 : index
    %c0_0 = arith.constant 0 : index
    %0 = vector.load %arg1[%c0, %c0_0] : memref<32x4xf32, #tpu.memory_space<vmem>>, vector<32x4xf32>
    %c0_1 = arith.constant 0 : index
    %c0_2 = arith.constant 0 : index
    %1 = vector.load %arg2[%c0_1, %c0_2] : memref<4x128xf32, #tpu.memory_space<vmem>>, vector<4x128xf32>
    %cst = arith.constant dense<0.000000e+00> : vector<32x128xf32>
    %2 = tpu.matmul %0, %1, %cst {dimension_numbers = #tpu.dot_dimension_numbers<[1], [0], [0], [1], [0, 0, 1, 1], [], []>} : vector<32x4xf32>, vector<4x128xf32>, vector<32x128xf32> -> vector<32x128xf32>
    %c0_3 = arith.constant 0 : index
    %c0_4 = arith.constant 0 : index
    %3 = vector.load %arg3[%c0_3, %c0_4] : memref<1x128xf32, #tpu.memory_space<vmem>>, vector<1x128xf32>
    %4 = vector.broadcast %3 : vector<1x128xf32> to vector<32x128xf32>
    %5 = arith.addf %2, %4 : vector<32x128xf32>
    %6 = vector.shape_cast %5 : vector<32x128xf32> to vector<2x16x128xf32>
    %cst_5 = arith.constant dense<0.000000e+00> : vector<2x128xf32>
    %7 = vector.multi_reduction <add>, %6, %cst_5 [1] : vector<2x16x128xf32> to vector<2x128xf32>
    %8 = vector.shape_cast %7 : vector<2x128xf32> to vector<2x1x128xf32>
    %cst_6 = arith.constant 6.250000e-02 : f32
    %9 = vector.broadcast %cst_6 : f32 to vector<2x1x128xf32>
    %10 = arith.mulf %8, %9 : vector<2x1x128xf32>
    %11 = arith.mulf %6, %6 : vector<2x16x128xf32>
    %cst_7 = arith.constant dense<0.000000e+00> : vector<2x128xf32>
    %12 = vector.multi_reduction <add>, %11, %cst_7 [1] : vector<2x16x128xf32> to vector<2x128xf32>
    %13 = vector.shape_cast %12 : vector<2x128xf32> to vector<2x1x128xf32>
    %cst_8 = arith.constant 6.250000e-02 : f32
    %14 = vector.broadcast %cst_8 : f32 to vector<2x1x128xf32>
    %15 = arith.mulf %13, %14 : vector<2x1x128xf32>
    %16 = arith.mulf %10, %10 : vector<2x1x128xf32>
    %17 = arith.subf %15, %16 : vector<2x1x128xf32>
    %cst_9 = arith.constant 0.000000e+00 : f32
    %18 = vector.broadcast %cst_9 : f32 to vector<2x1x128xf32>
    %19 = arith.maximumf %17, %18 : vector<2x1x128xf32>
    %cst_10 = arith.constant 9.99999974E-6 : f32
    %20 = vector.broadcast %cst_10 : f32 to vector<2x1x128xf32>
    %21 = arith.addf %19, %20 : vector<2x1x128xf32>
    %22 = math.rsqrt %21 : vector<2x1x128xf32>
    %23 = vector.broadcast %10 : vector<2x1x128xf32> to vector<2x16x128xf32>
    %24 = arith.subf %6, %23 : vector<2x16x128xf32>
    %25 = vector.broadcast %22 : vector<2x1x128xf32> to vector<2x16x128xf32>
    %26 = arith.mulf %24, %25 : vector<2x16x128xf32>
    %cst_11 = arith.constant 0.000000e+00 : f32
    %27 = vector.broadcast %cst_11 : f32 to vector<2x16x128xf32>
    %28 = arith.maximumf %26, %27 : vector<2x16x128xf32>
    %29 = vector.shape_cast %28 : vector<2x16x128xf32> to vector<32x128xf32>
    %c0_12 = arith.constant 0 : index
    %c0_13 = arith.constant 0 : index
    %30 = vector.load %arg4[%c0_12, %c0_13] : memref<128x128xbf16, #tpu.memory_space<vmem>>, vector<128x128xbf16>
    %31 = arith.truncf %29 : vector<32x128xf32> to vector<32x128xbf16>
    %cst_14 = arith.constant dense<0.000000e+00> : vector<32x128xf32>
    %32 = tpu.matmul %31, %30, %cst_14 {dimension_numbers = #tpu.dot_dimension_numbers<[1], [0], [0], [1], [0, 0, 1, 1], [], []>} : vector<32x128xbf16>, vector<128x128xbf16>, vector<32x128xf32> -> vector<32x128xf32>
    %c0_15 = arith.constant 0 : index
    %c0_16 = arith.constant 0 : index
    %33 = vector.load %arg5[%c0_15, %c0_16] : memref<1x128xf32, #tpu.memory_space<vmem>>, vector<1x128xf32>
    %34 = vector.broadcast %33 : vector<1x128xf32> to vector<32x128xf32>
    %35 = arith.addf %32, %34 : vector<32x128xf32>
    %36 = vector.shape_cast %35 : vector<32x128xf32> to vector<2x16x128xf32>
    %cst_17 = arith.constant dense<0.000000e+00> : vector<2x128xf32>
    %37 = vector.multi_reduction <add>, %36, %cst_17 [1] : vector<2x16x128xf32> to vector<2x128xf32>
    %38 = vector.shape_cast %37 : vector<2x128xf32> to vector<2x1x128xf32>
    %cst_18 = arith.constant 6.250000e-02 : f32
    %39 = vector.broadcast %cst_18 : f32 to vector<2x1x128xf32>
    %40 = arith.mulf %38, %39 : vector<2x1x128xf32>
    %41 = arith.mulf %36, %36 : vector<2x16x128xf32>
    %cst_19 = arith.constant dense<0.000000e+00> : vector<2x128xf32>
    %42 = vector.multi_reduction <add>, %41, %cst_19 [1] : vector<2x16x128xf32> to vector<2x128xf32>
    %43 = vector.shape_cast %42 : vector<2x128xf32> to vector<2x1x128xf32>
    %cst_20 = arith.constant 6.250000e-02 : f32
    %44 = vector.broadcast %cst_20 : f32 to vector<2x1x128xf32>
    %45 = arith.mulf %43, %44 : vector<2x1x128xf32>
    %46 = arith.mulf %40, %40 : vector<2x1x128xf32>
    %47 = arith.subf %45, %46 : vector<2x1x128xf32>
    %cst_21 = arith.constant 0.000000e+00 : f32
    %48 = vector.broadcast %cst_21 : f32 to vector<2x1x128xf32>
    %49 = arith.maximumf %47, %48 : vector<2x1x128xf32>
    %cst_22 = arith.constant 9.99999974E-6 : f32
    %50 = vector.broadcast %cst_22 : f32 to vector<2x1x128xf32>
    %51 = arith.addf %49, %50 : vector<2x1x128xf32>
    %52 = math.rsqrt %51 : vector<2x1x128xf32>
    %53 = vector.broadcast %40 : vector<2x1x128xf32> to vector<2x16x128xf32>
    %54 = arith.subf %36, %53 : vector<2x16x128xf32>
    %55 = vector.broadcast %52 : vector<2x1x128xf32> to vector<2x16x128xf32>
    %56 = arith.mulf %54, %55 : vector<2x16x128xf32>
    %cst_23 = arith.constant 0.000000e+00 : f32
    %57 = vector.broadcast %cst_23 : f32 to vector<2x16x128xf32>
    %58 = arith.maximumf %56, %57 : vector<2x16x128xf32>
    %59 = vector.shape_cast %58 : vector<2x16x128xf32> to vector<32x128xf32>
    %c0_24 = arith.constant 0 : index
    %c0_25 = arith.constant 0 : index
    %60 = vector.load %arg6[%c0_24, %c0_25] : memref<128x128xbf16, #tpu.memory_space<vmem>>, vector<128x128xbf16>
    %61 = arith.truncf %59 : vector<32x128xf32> to vector<32x128xbf16>
    %cst_26 = arith.constant dense<0.000000e+00> : vector<32x128xf32>
    %62 = tpu.matmul %61, %60, %cst_26 {dimension_numbers = #tpu.dot_dimension_numbers<[1], [0], [0], [1], [0, 0, 1, 1], [], []>} : vector<32x128xbf16>, vector<128x128xbf16>, vector<32x128xf32> -> vector<32x128xf32>
    %c0_27 = arith.constant 0 : index
    %c0_28 = arith.constant 0 : index
    %63 = vector.load %arg7[%c0_27, %c0_28] : memref<1x128xf32, #tpu.memory_space<vmem>>, vector<1x128xf32>
    %64 = vector.broadcast %63 : vector<1x128xf32> to vector<32x128xf32>
    %65 = arith.addf %62, %64 : vector<32x128xf32>
    %66 = vector.shape_cast %65 : vector<32x128xf32> to vector<2x16x128xf32>
    %cst_29 = arith.constant dense<0.000000e+00> : vector<2x128xf32>
    %67 = vector.multi_reduction <add>, %66, %cst_29 [1] : vector<2x16x128xf32> to vector<2x128xf32>
    %68 = vector.shape_cast %67 : vector<2x128xf32> to vector<2x1x128xf32>
    %cst_30 = arith.constant 6.250000e-02 : f32
    %69 = vector.broadcast %cst_30 : f32 to vector<2x1x128xf32>
    %70 = arith.mulf %68, %69 : vector<2x1x128xf32>
    %71 = arith.mulf %66, %66 : vector<2x16x128xf32>
    %cst_31 = arith.constant dense<0.000000e+00> : vector<2x128xf32>
    %72 = vector.multi_reduction <add>, %71, %cst_31 [1] : vector<2x16x128xf32> to vector<2x128xf32>
    %73 = vector.shape_cast %72 : vector<2x128xf32> to vector<2x1x128xf32>
    %cst_32 = arith.constant 6.250000e-02 : f32
    %74 = vector.broadcast %cst_32 : f32 to vector<2x1x128xf32>
    %75 = arith.mulf %73, %74 : vector<2x1x128xf32>
    %76 = arith.mulf %70, %70 : vector<2x1x128xf32>
    %77 = arith.subf %75, %76 : vector<2x1x128xf32>
    %cst_33 = arith.constant 0.000000e+00 : f32
    %78 = vector.broadcast %cst_33 : f32 to vector<2x1x128xf32>
    %79 = arith.maximumf %77, %78 : vector<2x1x128xf32>
    %cst_34 = arith.constant 9.99999974E-6 : f32
    %80 = vector.broadcast %cst_34 : f32 to vector<2x1x128xf32>
    %81 = arith.addf %79, %80 : vector<2x1x128xf32>
    %82 = math.rsqrt %81 : vector<2x1x128xf32>
    %83 = vector.broadcast %70 : vector<2x1x128xf32> to vector<2x16x128xf32>
    %84 = arith.subf %66, %83 : vector<2x16x128xf32>
    %85 = vector.broadcast %82 : vector<2x1x128xf32> to vector<2x16x128xf32>
    %86 = arith.mulf %84, %85 : vector<2x16x128xf32>
    %cst_35 = arith.constant 0.000000e+00 : f32
    %87 = vector.broadcast %cst_35 : f32 to vector<2x16x128xf32>
    %88 = arith.maximumf %86, %87 : vector<2x16x128xf32>
    %89 = vector.shape_cast %88 : vector<2x16x128xf32> to vector<32x128xf32>
    %c0_36 = arith.constant 0 : index
    %c0_37 = arith.constant 0 : index
    %90 = vector.load %arg8[%c0_36, %c0_37] : memref<128x128xbf16, #tpu.memory_space<vmem>>, vector<128x128xbf16>
    %91 = arith.truncf %89 : vector<32x128xf32> to vector<32x128xbf16>
    %cst_38 = arith.constant dense<0.000000e+00> : vector<32x128xf32>
    %92 = tpu.matmul %91, %90, %cst_38 {dimension_numbers = #tpu.dot_dimension_numbers<[1], [0], [0], [1], [0, 0, 1, 1], [], []>} : vector<32x128xbf16>, vector<128x128xbf16>, vector<32x128xf32> -> vector<32x128xf32>
    %c0_39 = arith.constant 0 : index
    %c0_40 = arith.constant 0 : index
    %93 = vector.load %arg9[%c0_39, %c0_40] : memref<1x128xf32, #tpu.memory_space<vmem>>, vector<1x128xf32>
    %94 = vector.broadcast %93 : vector<1x128xf32> to vector<32x128xf32>
    %95 = arith.addf %92, %94 : vector<32x128xf32>
    %96 = vector.shape_cast %95 : vector<32x128xf32> to vector<2x16x128xf32>
    %cst_41 = arith.constant dense<0.000000e+00> : vector<2x128xf32>
    %97 = vector.multi_reduction <add>, %96, %cst_41 [1] : vector<2x16x128xf32> to vector<2x128xf32>
    %98 = vector.shape_cast %97 : vector<2x128xf32> to vector<2x1x128xf32>
    %cst_42 = arith.constant 6.250000e-02 : f32
    %99 = vector.broadcast %cst_42 : f32 to vector<2x1x128xf32>
    %100 = arith.mulf %98, %99 : vector<2x1x128xf32>
    %101 = arith.mulf %96, %96 : vector<2x16x128xf32>
    %cst_43 = arith.constant dense<0.000000e+00> : vector<2x128xf32>
    %102 = vector.multi_reduction <add>, %101, %cst_43 [1] : vector<2x16x128xf32> to vector<2x128xf32>
    %103 = vector.shape_cast %102 : vector<2x128xf32> to vector<2x1x128xf32>
    %cst_44 = arith.constant 6.250000e-02 : f32
    %104 = vector.broadcast %cst_44 : f32 to vector<2x1x128xf32>
    %105 = arith.mulf %103, %104 : vector<2x1x128xf32>
    %106 = arith.mulf %100, %100 : vector<2x1x128xf32>
    %107 = arith.subf %105, %106 : vector<2x1x128xf32>
    %cst_45 = arith.constant 0.000000e+00 : f32
    %108 = vector.broadcast %cst_45 : f32 to vector<2x1x128xf32>
    %109 = arith.maximumf %107, %108 : vector<2x1x128xf32>
    %cst_46 = arith.constant 9.99999974E-6 : f32
    %110 = vector.broadcast %cst_46 : f32 to vector<2x1x128xf32>
    %111 = arith.addf %109, %110 : vector<2x1x128xf32>
    %112 = math.rsqrt %111 : vector<2x1x128xf32>
    %113 = vector.broadcast %100 : vector<2x1x128xf32> to vector<2x16x128xf32>
    %114 = arith.subf %96, %113 : vector<2x16x128xf32>
    %115 = vector.broadcast %112 : vector<2x1x128xf32> to vector<2x16x128xf32>
    %116 = arith.mulf %114, %115 : vector<2x16x128xf32>
    %cst_47 = arith.constant 0.000000e+00 : f32
    %117 = vector.broadcast %cst_47 : f32 to vector<2x16x128xf32>
    %118 = arith.maximumf %116, %117 : vector<2x16x128xf32>
    %119 = vector.shape_cast %118 : vector<2x16x128xf32> to vector<32x128xf32>
    %c0_48 = arith.constant 0 : index
    %c0_49 = arith.constant 0 : index
    %120 = vector.load %arg10[%c0_48, %c0_49] : memref<128x1024xbf16, #tpu.memory_space<vmem>>, vector<128x1024xbf16>
    %121 = arith.truncf %119 : vector<32x128xf32> to vector<32x128xbf16>
    %cst_50 = arith.constant dense<0.000000e+00> : vector<32x1024xf32>
    %122 = tpu.matmul %121, %120, %cst_50 {dimension_numbers = #tpu.dot_dimension_numbers<[1], [0], [0], [1], [0, 0, 1, 1], [], []>} : vector<32x128xbf16>, vector<128x1024xbf16>, vector<32x1024xf32> -> vector<32x1024xf32>
    %c0_51 = arith.constant 0 : index
    %c0_52 = arith.constant 0 : index
    %123 = vector.load %arg11[%c0_51, %c0_52] : memref<1x1024xf32, #tpu.memory_space<vmem>>, vector<1x1024xf32>
    %124 = vector.broadcast %123 : vector<1x1024xf32> to vector<32x1024xf32>
    %125 = arith.addf %122, %124 : vector<32x1024xf32>
    %126 = vector.shape_cast %125 : vector<32x1024xf32> to vector<2x16x1024xf32>
    %cst_53 = arith.constant dense<0.000000e+00> : vector<2x1024xf32>
    %127 = vector.multi_reduction <add>, %126, %cst_53 [1] : vector<2x16x1024xf32> to vector<2x1024xf32>
    %128 = vector.shape_cast %127 : vector<2x1024xf32> to vector<2x1x1024xf32>
    %cst_54 = arith.constant 6.250000e-02 : f32
    %129 = vector.broadcast %cst_54 : f32 to vector<2x1x1024xf32>
    %130 = arith.mulf %128, %129 : vector<2x1x1024xf32>
    %131 = arith.mulf %126, %126 : vector<2x16x1024xf32>
    %cst_55 = arith.constant dense<0.000000e+00> : vector<2x1024xf32>
    %132 = vector.multi_reduction <add>, %131, %cst_55 [1] : vector<2x16x1024xf32> to vector<2x1024xf32>
    %133 = vector.shape_cast %132 : vector<2x1024xf32> to vector<2x1x1024xf32>
    %cst_56 = arith.constant 6.250000e-02 : f32
    %134 = vector.broadcast %cst_56 : f32 to vector<2x1x1024xf32>
    %135 = arith.mulf %133, %134 : vector<2x1x1024xf32>
    %136 = arith.mulf %130, %130 : vector<2x1x1024xf32>
    %137 = arith.subf %135, %136 : vector<2x1x1024xf32>
    %cst_57 = arith.constant 0.000000e+00 : f32
    %138 = vector.broadcast %cst_57 : f32 to vector<2x1x1024xf32>
    %139 = arith.maximumf %137, %138 : vector<2x1x1024xf32>
    %cst_58 = arith.constant 9.99999974E-6 : f32
    %140 = vector.broadcast %cst_58 : f32 to vector<2x1x1024xf32>
    %141 = arith.addf %139, %140 : vector<2x1x1024xf32>
    %142 = math.rsqrt %141 : vector<2x1x1024xf32>
    %143 = vector.broadcast %130 : vector<2x1x1024xf32> to vector<2x16x1024xf32>
    %144 = arith.subf %126, %143 : vector<2x16x1024xf32>
    %145 = vector.broadcast %142 : vector<2x1x1024xf32> to vector<2x16x1024xf32>
    %146 = arith.mulf %144, %145 : vector<2x16x1024xf32>
    %cst_59 = arith.constant 0.000000e+00 : f32
    %147 = vector.broadcast %cst_59 : f32 to vector<2x16x1024xf32>
    %148 = arith.maximumf %146, %147 : vector<2x16x1024xf32>
    %149 = vector.shape_cast %148 : vector<2x16x1024xf32> to vector<32x1024xf32>
    %150 = vector.shape_cast %149 : vector<32x1024xf32> to vector<2x16x1024xf32>
    %cst_60 = arith.constant dense<0xFF800000> : vector<2x1024xf32>
    %151 = vector.multi_reduction <maximumf>, %150, %cst_60 [1] : vector<2x16x1024xf32> to vector<2x1024xf32>
    %c0_61 = arith.constant 0 : index
    %c0_62 = arith.constant 0 : index
    %152 = vector.load %arg12[%c0_61, %c0_62] : memref<2x1024xf32, #tpu.memory_space<vmem>>, vector<2x1024xf32>
    tpu.vector_store %arg12[%c0_61, %c0_62], %151 {strides = array<i32>} : memref<2x1024xf32, #tpu.memory_space<vmem>>, vector<2x1024xf32>,
    return
  }
  func.func @transform_0(%arg0: i32) -> (i32, i32) {
    %c0_i32 = arith.constant 0 : i32
    %c0_i32_0 = arith.constant 0 : i32
    return %arg0, %c0_i32 : i32, i32
  }
  func.func @transform_1(%arg0: i32) -> (i32, i32) {
    %c0_i32 = arith.constant 0 : i32
    %c0_i32_0 = arith.constant 0 : i32
    %c0_i32_1 = arith.constant 0 : i32
    return %c0_i32, %c0_i32_0 : i32, i32
  }
  func.func @transform_2(%arg0: i32) -> (i32, i32) {
    %c0_i32 = arith.constant 0 : i32
    %c0_i32_0 = arith.constant 0 : i32
    %c0_i32_1 = arith.constant 0 : i32
    return %c0_i32, %c0_i32_0 : i32, i32
  }
  func.func @transform_3(%arg0: i32) -> (i32, i32) {
    %c0_i32 = arith.constant 0 : i32
    %c0_i32_0 = arith.constant 0 : i32
    %c0_i32_1 = arith.constant 0 : i32
    return %c0_i32, %c0_i32_0 : i32, i32
  }
  func.func @transform_4(%arg0: i32) -> (i32, i32) {
    %c0_i32 = arith.constant 0 : i32
    %c0_i32_0 = arith.constant 0 : i32
    %c0_i32_1 = arith.constant 0 : i32
    return %c0_i32, %c0_i32_0 : i32, i32
  }
  func.func @transform_5(%arg0: i32) -> (i32, i32) {
    %c0_i32 = arith.constant 0 : i32
    %c0_i32_0 = arith.constant 0 : i32
    %c0_i32_1 = arith.constant 0 : i32
    return %c0_i32, %c0_i32_0 : i32, i32
  }
  func.func @transform_6(%arg0: i32) -> (i32, i32) {
    %c0_i32 = arith.constant 0 : i32
    %c0_i32_0 = arith.constant 0 : i32
    %c0_i32_1 = arith.constant 0 : i32
    return %c0_i32, %c0_i32_0 : i32, i32
  }
  func.func @transform_7(%arg0: i32) -> (i32, i32) {
    %c0_i32 = arith.constant 0 : i32
    %c0_i32_0 = arith.constant 0 : i32
    %c0_i32_1 = arith.constant 0 : i32
    return %c0_i32, %c0_i32_0 : i32, i32
  }
  func.func @transform_8(%arg0: i32) -> (i32, i32) {
    %c0_i32 = arith.constant 0 : i32
    %c0_i32_0 = arith.constant 0 : i32
    %c0_i32_1 = arith.constant 0 : i32
    return %c0_i32, %c0_i32_0 : i32, i32
  }
  func.func @transform_9(%arg0: i32) -> (i32, i32) {
    %c0_i32 = arith.constant 0 : i32
    %c0_i32_0 = arith.constant 0 : i32
    %c0_i32_1 = arith.constant 0 : i32
    return %c0_i32, %c0_i32_0 : i32, i32
  }
  func.func @transform_10(%arg0: i32) -> (i32, i32) {
    %c0_i32 = arith.constant 0 : i32
    %c0_i32_0 = arith.constant 0 : i32
    %c0_i32_1 = arith.constant 0 : i32
    return %c0_i32, %c0_i32_0 : i32, i32
  }
  func.func @transform_11(%arg0: i32) -> (i32, i32) {
    %c0_i32 = arith.constant 0 : i32
    %c0_i32_0 = arith.constant 0 : i32
    return %arg0, %c0_i32 : i32, i32
  }
}

</mosaic_0001>

<bundles_post_ra>
// kernel: tpu_custom_call.1
= control target key start
LH: loop header
LB: loop body
LE: loop exit
PB: predicated region body
PF: predicated region fallthrough
CT: control target
= control target key end

     0   :  { %16 = vsyncpa [#allocation3], 0  ;;  %s3163_s0 = inlined_call_operand.vmem [shape: f32[32,4], index: 0, kind: input, shape index: {}]   ;;  %s3164_s1 = inlined_call_operand.vmem [shape: f32[4,128], index: 1, kind: input, shape index: {}]   ;;  %s3165_s2 = inlined_call_operand.vmem [shape: f32[1,128], index: 2, kind: input, shape index: {}]   ;;  %s3166_s3 = inlined_call_operand.hbm [shape: bf16[128,128], index: 3, kind: input, shape index: {}]   ;;  %s3167_s4 = inlined_call_operand.vmem [shape: f32[1,128], index: 4, kind: input, shape index: {}]   ;;  %s3168_s5 = inlined_call_operand.hbm [shape: bf16[128,128], index: 5, kind: input, shape index: {}]   ;;  %s3169_s6 = inlined_call_operand.vmem [shape: f32[1,128], index: 6, kind: input, shape index: {}]   ;;  %s3170_s7 = inlined_call_operand.hbm [shape: bf16[128,128], index: 7, kind: input, shape index: {}]   ;;  %s3171_s8 = inlined_call_operand.vmem [shape: f32[1,128], index: 8, kind: input, shape index: {}]   ;;  %s3172_s9 = inlined_call_operand.hbm [shape: bf16[128,1024], index: 9, kind: input, shape index: {}]   ;;  %s3173_s10 = inlined_call_operand.vmem [shape: f32[1,1024], index: 10, kind: input, shape index: {}]   ;;  %s3174_s11 = inlined_call_operand.hbm [shape: f32[2,1024], index: 11, kind: output, shape index: {}]  }
   0x1   :  { %17 = vsyncpa [#allocation6], 0 }
   0x2   :  { %18 = vsyncpa [#allocation9], 0 }
   0x3   :  { %19 = vsyncpa [#allocation4], 0  ;;  %s2555_s17 = smov [#allocation5]   ;;  %s2556_s19 = smov [#allocation2]  }
   0x4   :  { %s45_s18 = sshll.u32 %s2555_s17, 4  ;;  %s31_s20 = sshll.u32 %s2556_s19, 4  ;;  %s46_s18 = int_to_ptr.vmem [resolvable:$true] %s45_s18  ;;  %s32_s20 = int_to_ptr.vmem [resolvable:$true] %s31_s20 }
   0x5   :  { %s2455_s21 = scalar_lea.vmem %s46_s18, 1024  ;;  %p2460_p1 = scmp.lt.s32.totalorder %s46_s18, %s46_s18 }
   0x6   :  { %p2456_p0 = scmp.ne.s32.totalorder %s46_s18, %s2455_s21  ;;  %p2461_p2 = scmp.lt.s32.totalorder %s2455_s21, %s2455_s21 }
   0x8   :  { %p2462_p3 = por %p2461_p2, %p2460_p1 }
   0xa   :  { %p2463_p4 = pnand %p2462_p3, %p2456_p0 }
   0xc   :  { %2466 = shalt.err (!%p2463_p4)
}
   0xd   :  { %s2557_s22 = smov 64   ;;  %s2558_s23 = smov 4  }
   0xe   :  { %51 = dma.hbm_to_vmem [thread:$0]  %s3168_s5, 1024, %s46_s18, [#allocation6], %s2557_s22, %s2557_s22, %s2558_s23  }
   0xf   :  { %s2475_s26 = scalar_lea.vmem %s32_s20, 1024  ;;  %p2480_p6 = scmp.lt.s32.totalorder %s32_s20, %s32_s20 }
  0x10   :  { %p2476_p5 = scmp.ne.s32.totalorder %s32_s20, %s2475_s26  ;;  %p2481_p7 = scmp.lt.s32.totalorder %s2475_s26, %s2475_s26 }
  0x12   :  { %p2482_p8 = por %p2481_p7, %p2480_p6 }
  0x14   :  { %p2483_p9 = pnand %p2482_p8, %p2476_p5 }
  0x16   :  { %2486 = shalt.err (!%p2483_p9)
}
  0x17   :  { %37 = dma.hbm_to_vmem [thread:$0]  %s3166_s3, 1024, %s32_s20, [#allocation3], %s2557_s22, %s2557_s22, %s2558_s23  }
  0x18   :  { %s2559_s29 = smov [#allocation7]   ;;  %s2560_s12 = smov [#allocation8]  }
  0x19   :  { %s59_s30 = sshll.u32 %s2559_s29, 4  ;;  %s73_s13 = sshll.u32 %s2560_s12, 4  ;;  %s60_s30 = int_to_ptr.vmem [resolvable:$true] %s59_s30  ;;  %s74_s13 = int_to_ptr.vmem [resolvable:$true] %s73_s13 }
  0x1a   :  { %s2495_s14 = scalar_lea.vmem %s60_s30, 1024  ;;  %p2500_p11 = scmp.lt.s32.totalorder %s60_s30, %s60_s30 }
  0x1b   :  { %p2496_p10 = scmp.ne.s32.totalorder %s60_s30, %s2495_s14  ;;  %p2501_p12 = scmp.lt.s32.totalorder %s2495_s14, %s2495_s14 }
  0x1d   :  { %p2502_p13 = por %p2501_p12, %p2500_p11 }
  0x1f   :  { %p2503_p0 = pnand %p2502_p13, %p2496_p10 }
  0x21   :  { %2506 = shalt.err (!%p2503_p0)
}
  0x22   :  { %65 = dma.hbm_to_vmem [thread:$0]  %s3170_s7, 1024, %s60_s30, [#allocation6], %s2557_s22, %s2557_s22, %s2558_s23  }
  0x23   :  { %s2515_s16 = scalar_lea.vmem %s74_s13, 8192  ;;  %p2520_p2 = scmp.lt.s32.totalorder %s74_s13, %s74_s13 }
  0x24   :  { %p2516_p1 = scmp.ne.s32.totalorder %s74_s13, %s2515_s16  ;;  %p2521_p3 = scmp.lt.s32.totalorder %s2515_s16, %s2515_s16 }
  0x26   :  { %p2522_p4 = por %p2521_p3, %p2520_p2 }
  0x28   :  { %p2523_p5 = pnand %p2522_p4, %p2516_p1 }
  0x2a   :  { %2526 = shalt.err (!%p2523_p5)
}
  0x2b   :  { %s2561_s3 = smov 512   ;;  %s2562_s17 = smov 32  }
  0x2c   :  { %79 = dma.hbm_to_vmem [thread:$0]  %s3172_s9, 8192, %s74_s13, [#allocation9], %s2561_s3, %s2561_s3, %s2562_s17  }
  0x2d   :  { %2547 = dma.done.wait [#allocation3], 1024  }
  0x2e   :  { %2548 = vsyncadd [#allocation3], 4294966272 }
  0x2f   :  { %2549 = dma.done.wait [#allocation6], 2048  }
  0x30   :  { %2550 = vsyncadd [#allocation6], 4294965248 }
  0x31   :  { %2551 = dma.done.wait [#allocation9], 8192  }
  0x32   :  { %2552 = vsyncadd [#allocation9], 4294959104  ;;  %vm120_vm0 = vcmask 1043456   ;;  %vm107_vm1 = vcmask 31744   ;;  %v99_v0 = vld [vmem:[%s3164_s1] sm:$0xf] }
  0x33   :  { %v95_v1 = vld [vmem:[%s3163_s0] sm:$0xff]  ;;  %v96_v2 = vld [vmem:[%s3163_s0 + $0x8] sm:$0xff]  ;;  %2280 = vmatprep.subr.msk.mxu0 %vm120_vm0, %v99_v0  ;;  %v97_v3 = vld [vmem:[%s3163_s0 + $0x10] sm:$0xff]  ;;  %vm2112_vm2 = vcmask 1041409   ;;  %vm2114_vm3 = vcmask 1043459   ;;  %vm2116_vm4 = vcmask 1045509  }
  0x34   :  { %2282 = vmatprep.mubr.msk.f32.mxu0 %vm107_vm1, %v95_v1  ;;  %2281 = vmatpush3.msk.msra.mxu0 %vm120_vm0, %v99_v0  ;;  %v98_v4 = vld [vmem:[%s3163_s0 + $0x18] sm:$0xff]  ;;  %v2376_v6 = vld [vmem:[#allocation2 + $0x30] sm:$0xff]   ;;  %v2377_v7 = vld [vmem:[#allocation2 + $0x28] sm:$0xff]   ;;  %vm2118_vm5 = vcmask 1047559  }
  0x35   :  { %2283 = vmatmul.mubr.msk.f32.vlgmr.msra.gmra.mxu0 %vm107_vm1, %v96_v2  ;;  %v2375_v5 = vld [vmem:[#allocation2 + $0x38] sm:$0xff]   ;;  %v2378_v8 = vld [vmem:[#allocation2 + $0x20] sm:$0xff]   ;;  %v2380_v10 = vld [vmem:[#allocation2 + $0x10] sm:$0xff]  }
  0x36   :  { %2285 = vmatprep.mubr.msk.f32.mxu0 %vm107_vm1, %v97_v3  ;;  %2288 = vmatprep.subr.bf16.mxu1 %v2375_v5  ;;  %v2379_v9 = vld [vmem:[#allocation2 + $0x18] sm:$0xff]   ;;  %v2381_v11 = vld [vmem:[#allocation2 + $0x8] sm:$0xff]   ;;  %v2382_v12 = vld [vmem:[#allocation2] sm:$0xff]  }
  0x37   :  { %2289 = vmatpush3.bf16.msra.mxu1 %v2375_v5  ;;  %v2148_v13 = vld [vmem:[%s3165_s2] ss:$0 sm:$0xff] }
  0x38   :  { %2290 = vmatprep.subr.bf16.mxu1 %v2376_v6 }
  0x39   :  { %2286 = vmatmul.mubr.msk.f32.gmra.mxu0 %vm107_vm1, %v98_v4 }
  0x3b   :  { %2291 = vmatpush3.bf16.msra.mxu1 %v2376_v6 }
  0x3c   :  { %2292 = vmatprep.subr.bf16.mxu1 %v2377_v7 }
  0x3f   :  { %2293 = vmatpush3.bf16.msra.mxu1 %v2377_v7 }
  0x40   :  { %2294 = vmatprep.subr.bf16.mxu1 %v2378_v8 }
  0x43   :  { %2295 = vmatpush3.bf16.msra.mxu1 %v2378_v8 }
  0x44   :  { %2296 = vmatprep.subr.bf16.mxu1 %v2379_v9 }
  0x47   :  { %2297 = vmatpush3.bf16.msra.mxu1 %v2379_v9 }
  0x48   :  { %2298 = vmatprep.subr.bf16.mxu1 %v2380_v10 }
  0x4b   :  { %2299 = vmatpush3.bf16.msra.mxu1 %v2380_v10 }
  0x4c   :  { %2300 = vmatprep.subr.bf16.mxu1 %v2381_v11 }
  0x4f   :  { %2301 = vmatpush3.bf16.msra.mxu1 %v2381_v11 }
  0x50   :  { %2302 = vmatprep.subr.bf16.mxu1 %v2382_v12 }
  0x53   :  { %2303 = vmatpush3.bf16.msra.mxu1 %v2382_v12 }
  0xf5   :  { %v2284_v14 = vpop.f32.mrf.mxu0 }
  0xf6   :  { %v196_v15 = vadd.f32 %v2284_v14, %v2148_v13 }
  0xf7   :  { %v190_v16 = vpop.f32.mrf.mxu0 }
  0xf8   :  { %v191_v17 = vadd.f32 %v2148_v13, %v190_v16  ;;  %v226_v19 = vmul.f32 %v196_v15, %v196_v15 }
  0xf9   :  { %v2287_v18 = vpop.f32.mrf.mxu0 }
  0xfa   :  { %v209_v20 = vadd.f32 %v196_v15, %v191_v17  ;;  %v225_v21 = vmul.f32 %v191_v17, %v191_v17  ;;  %v206_v22 = vadd.f32 %v2287_v18, %v2148_v13 }
  0xfb   :  { %v200_v23 = vpop.f32.mrf.mxu0 }
  0xfc   :  { %v210_v24 = vrot.slane %v209_v20, 4  ;;  %v229_v25 = vadd.f32 %v226_v19, %v225_v21  ;;  %v201_v26 = vadd.f32 %v2148_v13, %v200_v23  ;;  %v228_v27 = vmul.f32 %v206_v22, %v206_v22  ;;  %v2386_v21 = vld [vmem:[#allocation5 + $0x20] sm:$0xff]   ;;  %v2388_v23 = vld [vmem:[#allocation5 + $0x10] sm:$0xff]  }
  0xfe   :  { %v211_v28 = vadd.f32 %v210_v24, %v209_v20  ;;  %v230_v29 = vrot.slane %v229_v25, 4  ;;  %v216_v30 = vadd.f32 %v206_v22, %v201_v26  ;;  %v227_v31 = vmul.f32 %v201_v26, %v201_v26  ;;  %v2383_v20 = vld [vmem:[#allocation5 + $0x38] sm:$0xff]   ;;  %v2389_v24 = vld [vmem:[#allocation5 + $0x8] sm:$0xff]  }
  0xff   :  { %2308 = vmatprep.subr.bf16.mxu0 %v2383_v20 }
 0x100   :  { %v212_v32 = vrot.slane %v211_v28, 2  ;;  %v231_v33 = vadd.f32 %v230_v29, %v229_v25  ;;  %v217_v34 = vrot.slane %v216_v30, 4  ;;  %v236_v35 = vadd.f32 %v228_v27, %v227_v31  ;;  %2309 = vmatpush3.bf16.msra.mxu0 %v2383_v20  ;;  %v2390_v25 = vld [vmem:[#allocation5] sm:$0xff]  }
 0x101   :  { %v2154_v27 = vld [vmem:[%s3167_s4] ss:$0 sm:$0xff] }
 0x102   :  { %v213_v36 = vadd.f32 %v212_v32, %v211_v28  ;;  %v232_v37 = vrot.slane %v231_v33, 2  ;;  %v218_v38 = vadd.f32 %v217_v34, %v216_v30  ;;  %v237_v39 = vrot.slane %v236_v35, 4 }
 0x104   :  { %v214_v40 = vrot.slane %v213_v36, 1  ;;  %v233_v41 = vadd.f32 %v232_v37, %v231_v33  ;;  %v219_v42 = vrot.slane %v218_v38, 2  ;;  %v238_v43 = vadd.f32 %v237_v39, %v236_v35 }
 0x106   :  { %v234_v44 = vrot.slane %v233_v41, 1  ;;  %v220_v45 = vadd.f32 %v219_v42, %v218_v38  ;;  %v239_v46 = vrot.slane %v238_v43, 2  ;;  %v215_v47 = vadd.f32 %v214_v40, %v213_v36 }
 0x108   :  { %v235_v48 = vadd.f32 %v234_v44, %v233_v41  ;;  %v221_v49 = vrot.slane %v220_v45, 1  ;;  %v240_v50 = vadd.f32 %v239_v46, %v238_v43  ;;  %v223_v51 = vmul.f32 0.0625, %v215_v47 }
 0x10a   :  { %v243_v52 = vmul.f32 0.0625, %v235_v48  ;;  %v222_v53 = vadd.f32 %v221_v49, %v220_v45  ;;  %v241_v54 = vrot.slane %v240_v50, 1  ;;  %v245_v55 = vmul.f32 %v223_v51, %v223_v51 }
 0x10b   :  { %v255_v2 = vsub.f32 %v191_v17, %v223_v51  ;;  %v256_v3 = vsub.f32 %v196_v15, %v223_v51  ;;  %v2384_v15 = vld [vmem:[#allocation5 + $0x30] sm:$0xff]   ;;  %v2385_v17 = vld [vmem:[#allocation5 + $0x28] sm:$0xff]  }
 0x10c   :  { %v224_v56 = vmul.f32 0.0625, %v222_v53  ;;  %v242_v57 = vadd.f32 %v241_v54, %v240_v50  ;;  %v247_v58 = vsub.f32 %v243_v52, %v245_v55  ;;  %2310 = vmatprep.subr.bf16.mxu0 %v2384_v15 }
 0x10d   :  { %2311 = vmatpush3.bf16.msra.mxu0 %v2384_v15 }
 0x10e   :  { %v244_v59 = vmul.f32 0.0625, %v242_v57  ;;  %v246_v60 = vmul.f32 %v224_v56, %v224_v56  ;;  %v249_v61 = vmax.f32 %v247_v58, 0.0  ;;  %v257_v7 = vsub.f32 %v201_v26, %v224_v56  ;;  %2312 = vmatprep.subr.bf16.mxu0 %v2385_v17 }
 0x10f   :  { %v258_v10 = vsub.f32 %v206_v22, %v224_v56  ;;  %v2387_v22 = vld [vmem:[#allocation5 + $0x18] sm:$0xff]  }
 0x110   :  { %v248_v62 = vsub.f32 %v244_v59, %v246_v60  ;;  %v251_v63 = vadd.f32 1e-05, %v249_v61 }
 0x111   :  { %2313 = vmatpush3.bf16.msra.mxu0 %v2385_v17 }
 0x112   :  { %v250_v0 = vmax.f32 %v248_v62, 0.0  ;;  %2399 = vrsqrt.f32 %v251_v63  ;;  %2314 = vmatprep.subr.bf16.mxu0 %v2386_v21 }
 0x114   :  { %v252_v1 = vadd.f32 1e-05, %v250_v0 }
 0x115   :  { %2315 = vmatpush3.bf16.msra.mxu0 %v2386_v21 }
 0x116   :  { %2401 = vrsqrt.f32 %v252_v1  ;;  %2316 = vmatprep.subr.bf16.mxu0 %v2387_v22 }
 0x119   :  { %2317 = vmatpush3.bf16.msra.mxu0 %v2387_v22 }
 0x11a   :  { %2318 = vmatprep.subr.bf16.mxu0 %v2388_v23 }
 0x11d   :  { %2319 = vmatpush3.bf16.msra.mxu0 %v2388_v23 }
 0x11e   :  { %2320 = vmatprep.subr.bf16.mxu0 %v2389_v24 }
 0x11f   :  { %v2400_v4 = vpop.eup %2399 }
 0x120   :  { %v259_v5 = vmul.f32 %v2400_v4, %v255_v2  ;;  %v260_v6 = vmul.f32 %v2400_v4, %v256_v3 }
 0x121   :  { %2321 = vmatpush3.bf16.msra.mxu0 %v2389_v24 }
 0x122   :  { %v263_v8 = vmax.f32 %v259_v5, 0.0  ;;  %v264_v9 = vmax.f32 %v260_v6, 0.0  ;;  %2322 = vmatprep.subr.bf16.mxu0 %v2390_v25 }
 0x123   :  { %v2402_v11 = vpop.eup %2401 }
 0x124   :  { %v283_v12 = vpack.c.bf16 %v264_v9, %v263_v8  ;;  %v261_v13 = vmul.f32 %v2402_v11, %v257_v7  ;;  %v262_v14 = vmul.f32 %v2402_v11, %v258_v10 }
 0x125   :  { %2323 = vmatpush3.bf16.msra.mxu0 %v2390_v25 }
 0x126   :  { %2304 = vmatprep.mubr.bf16.mxu1 %v283_v12  ;;  %v265_v16 = vmax.f32 %v261_v13, 0.0  ;;  %v266_v18 = vmax.f32 %v262_v14, 0.0 }
 0x128   :  { %v284_v19 = vpack.c.bf16 %v266_v18, %v265_v16 }
 0x12a   :  { %2305 = vmatmul.mubr.bf16.vlgmr.msra.gmra.mxu1 %v284_v19 }
 0x1ea   :  { %v2306_v26 = vpop.f32.mrf.mxu1 }
 0x1eb   :  { %v383_v29 = vadd.f32 %v2306_v26, %v2154_v27 }
 0x1ec   :  { %v374_v28 = vpop.f32.mrf.mxu1 }
 0x1ed   :  { %v375_v30 = vadd.f32 %v2154_v27, %v374_v28  ;;  %v407_v34 = vmul.f32 %v383_v29, %v383_v29 }
 0x1ee   :  { %v2307_v31 = vpop.f32.mrf.mxu1 }
 0x1ef   :  { %v386_v32 = vadd.f32 %v2307_v31, %v2154_v27  ;;  %v405_v38 = vmul.f32 %v375_v30, %v375_v30 }
 0x1f0   :  { %v377_v33 = vpop.f32.mrf.mxu1 }
 0x1f1   :  { %v396_v35 = vadd.f32 %v386_v32, %v383_v29  ;;  %v408_v36 = vmul.f32 %v386_v32, %v386_v32  ;;  %v378_v37 = vadd.f32 %v2154_v27, %v377_v33 }
 0x1f3   :  { %v397_v39 = vrot.slane %v396_v35, 4  ;;  %v416_v40 = vadd.f32 %v408_v36, %v407_v34  ;;  %v389_v41 = vadd.f32 %v378_v37, %v375_v30  ;;  %v406_v42 = vmul.f32 %v378_v37, %v378_v37  ;;  %v2391_v34 = vld [vmem:[#allocation7 + $0x38] sm:$0xff]   ;;  %v2396_v36 = vld [vmem:[#allocation7 + $0x10] sm:$0xff]  }
 0x1f4   :  { %2328 = vmatprep.subr.bf16.mxu1 %v2391_v34 }
 0x1f5   :  { %v398_v43 = vadd.f32 %v397_v39, %v396_v35  ;;  %v417_v44 = vrot.slane %v416_v40, 4  ;;  %v390_v45 = vrot.slane %v389_v41, 4  ;;  %v409_v46 = vadd.f32 %v406_v42, %v405_v38  ;;  %2329 = vmatpush3.bf16.msra.mxu1 %v2391_v34  ;;  %v2395_v35 = vld [vmem:[#allocation7 + $0x18] sm:$0xff]   ;;  %v2398_v38 = vld [vmem:[#allocation7] sm:$0xff]  }
 0x1f7   :  { %v399_v47 = vrot.slane %v398_v43, 2  ;;  %v418_v48 = vadd.f32 %v417_v44, %v416_v40  ;;  %v391_v49 = vadd.f32 %v390_v45, %v389_v41  ;;  %v410_v50 = vrot.slane %v409_v46, 4  ;;  %v2163_v40 = vld [vmem:[%s3169_s6] ss:$0 sm:$0xff] }
 0x1f9   :  { %v400_v51 = vadd.f32 %v399_v47, %v398_v43  ;;  %v419_v52 = vrot.slane %v418_v48, 2  ;;  %v392_v53 = vrot.slane %v391_v49, 2  ;;  %v411_v54 = vadd.f32 %v410_v50, %v409_v46 }
 0x1fb   :  { %v401_v55 = vrot.slane %v400_v51, 1  ;;  %v420_v56 = vadd.f32 %v419_v52, %v418_v48  ;;  %v393_v57 = vadd.f32 %v392_v53, %v391_v49  ;;  %v412_v58 = vrot.slane %v411_v54, 2 }
 0x1fd   :  { %v402_v59 = vadd.f32 %v401_v55, %v400_v51  ;;  %v421_v60 = vrot.slane %v420_v56, 1  ;;  %v394_v61 = vrot.slane %v393_v57, 1  ;;  %v413_v62 = vadd.f32 %v412_v58, %v411_v54 }
 0x1ff   :  { %v404_v63 = vmul.f32 0.0625, %v402_v59  ;;  %v422_v0 = vadd.f32 %v421_v60, %v420_v56  ;;  %v395_v1 = vadd.f32 %v394_v61, %v393_v57  ;;  %v414_v2 = vrot.slane %v413_v62, 1 }
 0x201   :  { %v424_v3 = vmul.f32 0.0625, %v422_v0  ;;  %v426_v4 = vmul.f32 %v404_v63, %v404_v63  ;;  %v403_v5 = vmul.f32 0.0625, %v395_v1  ;;  %v415_v6 = vadd.f32 %v414_v2, %v413_v62 }
 0x202   :  { %v437_v16 = vsub.f32 %v383_v29, %v404_v63  ;;  %v438_v18 = vsub.f32 %v386_v32, %v404_v63  ;;  %v2392_v29 = vld [vmem:[#allocation7 + $0x30] sm:$0xff]   ;;  %v2393_v32 = vld [vmem:[#allocation7 + $0x28] sm:$0xff]  }
 0x203   :  { %v428_v7 = vsub.f32 %v424_v3, %v426_v4  ;;  %v423_v8 = vmul.f32 0.0625, %v415_v6  ;;  %v425_v9 = vmul.f32 %v403_v5, %v403_v5  ;;  %v436_v17 = vsub.f32 %v378_v37, %v403_v5  ;;  %2330 = vmatprep.subr.bf16.mxu1 %v2392_v29  ;;  %v2397_v37 = vld [vmem:[#allocation7 + $0x8] sm:$0xff]  }
 0x204   :  { %v435_v21 = vsub.f32 %v375_v30, %v403_v5  ;;  %2331 = vmatpush3.bf16.msra.mxu1 %v2392_v29  ;;  %v2394_v30 = vld [vmem:[#allocation7 + $0x20] sm:$0xff]  }
 0x205   :  { %v430_v10 = vmax.f32 %v428_v7, 0.0  ;;  %v427_v11 = vsub.f32 %v423_v8, %v425_v9  ;;  %2332 = vmatprep.subr.bf16.mxu1 %v2393_v32 }
 0x207   :  { %v432_v12 = vadd.f32 1e-05, %v430_v10  ;;  %v429_v13 = vmax.f32 %v427_v11, 0.0 }
 0x208   :  { %2333 = vmatpush3.bf16.msra.mxu1 %v2393_v32 }
 0x209   :  { %2403 = vrsqrt.f32 %v432_v12  ;;  %v431_v14 = vadd.f32 1e-05, %v429_v13  ;;  %2334 = vmatprep.subr.bf16.mxu1 %v2394_v30 }
 0x20b   :  { %2405 = vrsqrt.f32 %v431_v14 }
 0x20c   :  { %2335 = vmatpush3.bf16.msra.mxu1 %v2394_v30 }
 0x20d   :  { %2336 = vmatprep.subr.bf16.mxu1 %v2395_v35 }
 0x210   :  { %2337 = vmatpush3.bf16.msra.mxu1 %v2395_v35 }
 0x211   :  { %2338 = vmatprep.subr.bf16.mxu1 %v2396_v36 }
 0x214   :  { %2339 = vmatpush3.bf16.msra.mxu1 %v2396_v36 }
 0x215   :  { %2340 = vmatprep.subr.bf16.mxu1 %v2397_v37 }
 0x216   :  { %v2404_v19 = vpop.eup %2403 }
 0x217   :  { %v441_v20 = vmul.f32 %v2404_v19, %v437_v16  ;;  %v442_v15 = vmul.f32 %v2404_v19, %v438_v18 }
 0x218   :  { %v2406_v22 = vpop.eup %2405  ;;  %2341 = vmatpush3.bf16.msra.mxu1 %v2397_v37 }
 0x219   :  { %v439_v23 = vmul.f32 %v2406_v22, %v435_v21  ;;  %v440_v24 = vmul.f32 %v2406_v22, %v436_v17  ;;  %v445_v25 = vmax.f32 %v441_v20, 0.0  ;;  %v446_v26 = vmax.f32 %v442_v15, 0.0  ;;  %2342 = vmatprep.subr.bf16.mxu1 %v2398_v38 }
 0x21b   :  { %v443_v27 = vmax.f32 %v439_v23, 0.0  ;;  %v444_v28 = vmax.f32 %v440_v24, 0.0  ;;  %v464_v33 = vpack.c.bf16 %v446_v26, %v445_v25 }
 0x21c   :  { %2343 = vmatpush3.bf16.msra.mxu1 %v2398_v38 }
 0x21d   :  { %v463_v31 = vpack.c.bf16 %v444_v28, %v443_v27 }
 0x21f   :  { %2324 = vmatprep.mubr.bf16.mxu0 %v463_v31 }
 0x220   :  { %2325 = vmatmul.mubr.bf16.vlgmr.msra.gmra.mxu0 %v464_v33 }
 0x2e0   :  { %v2326_v39 = vpop.f32.mrf.mxu0 }
 0x2e1   :  { %v563_v42 = vadd.f32 %v2326_v39, %v2163_v40 }
 0x2e2   :  { %v554_v41 = vpop.f32.mrf.mxu0 }
 0x2e3   :  { %v555_v43 = vadd.f32 %v2163_v40, %v554_v41  ;;  %v587_v47 = vmul.f32 %v563_v42, %v563_v42 }
 0x2e4   :  { %v2327_v44 = vpop.f32.mrf.mxu0 }
 0x2e5   :  { %v566_v45 = vadd.f32 %v2327_v44, %v2163_v40  ;;  %v585_v51 = vmul.f32 %v555_v43, %v555_v43 }
 0x2e6   :  { %v557_v46 = vpop.f32.mrf.mxu0 }
 0x2e7   :  { %v576_v48 = vadd.f32 %v566_v45, %v563_v42  ;;  %v588_v49 = vmul.f32 %v566_v45, %v566_v45  ;;  %v558_v50 = vadd.f32 %v2163_v40, %v557_v46 }
 0x2e9   :  { %v577_v52 = vrot.slane %v576_v48, 4  ;;  %v596_v53 = vadd.f32 %v588_v49, %v587_v47  ;;  %v569_v54 = vadd.f32 %v558_v50, %v555_v43  ;;  %v586_v55 = vmul.f32 %v558_v50, %v558_v50  ;;  %v863_v47 = vld [vmem:[#allocation8 + $0x1c0] sm:$0xff]  ;;  %v868_v49 = vld [vmem:[#allocation8 + $0x1e8] sm:$0xff] }
 0x2eb   :  { %v578_v56 = vadd.f32 %v577_v52, %v576_v48  ;;  %v597_v57 = vrot.slane %v596_v53, 4  ;;  %v570_v58 = vrot.slane %v569_v54, 4  ;;  %v589_v59 = vadd.f32 %v586_v55, %v585_v51  ;;  %v867_v48 = vld [vmem:[#allocation8 + $0x1e0] sm:$0xff] }
 0x2ec   :  { %v2237_v51 = vcombine.low %v863_v47, %v867_v48 }
 0x2ed   :  { %v579_v60 = vrot.slane %v578_v56, 2  ;;  %v598_v61 = vadd.f32 %v597_v57, %v596_v53  ;;  %v571_v62 = vadd.f32 %v570_v58, %v569_v54  ;;  %v590_v63 = vrot.slane %v589_v59, 4  ;;  %v859_v53 = vld [vmem:[#allocation8 + $0x1a0] sm:$0xff]  ;;  %v856_v54 = vld [vmem:[#allocation8 + $0x188] sm:$0xff] }
 0x2ef   :  { %v580_v0 = vadd.f32 %v579_v60, %v578_v56  ;;  %v599_v1 = vrot.slane %v598_v61, 2  ;;  %v572_v2 = vrot.slane %v571_v62, 2  ;;  %v591_v3 = vadd.f32 %v590_v63, %v589_v59  ;;  %v860_v56 = vld [vmem:[#allocation8 + $0x1a8] sm:$0xff]  ;;  %v847_v60 = vld [vmem:[#allocation8 + $0x140] sm:$0xff] }
 0x2f0   :  { %v2231_v58 = vcombine.low %v856_v54, %v860_v56  ;;  %v2232_v59 = vcombine.high %v856_v54, %v860_v56  ;;  %v2172_v54 = vld [vmem:[%s3171_s8] ss:$0 sm:$0xff] }
 0x2f1   :  { %v581_v4 = vrot.slane %v580_v0, 1  ;;  %v600_v5 = vadd.f32 %v599_v1, %v598_v61  ;;  %v573_v6 = vadd.f32 %v572_v2, %v571_v62  ;;  %v592_v7 = vrot.slane %v591_v3, 2  ;;  %v851_v61 = vld [vmem:[#allocation8 + $0x160] sm:$0xff]  ;;  %v848_v62 = vld [vmem:[#allocation8 + $0x148] sm:$0xff] }
 0x2f2   :  { %v2222_v63 = vcombine.high %v847_v60, %v851_v61  ;;  %v2221_v1 = vcombine.low %v847_v60, %v851_v61 }
 0x2f3   :  { %v582_v8 = vadd.f32 %v581_v4, %v580_v0  ;;  %v601_v9 = vrot.slane %v600_v5, 1  ;;  %v574_v10 = vrot.slane %v573_v6, 1  ;;  %v593_v11 = vadd.f32 %v592_v7, %v591_v3  ;;  %v852_v0 = vld [vmem:[#allocation8 + $0x168] sm:$0xff]  ;;  %v839_v4 = vld [vmem:[#allocation8 + $0x100] sm:$0xff] }
 0x2f4   :  { %v2223_v2 = vcombine.low %v848_v62, %v852_v0  ;;  %v2224_v3 = vcombine.high %v848_v62, %v852_v0 }
 0x2f5   :  { %v584_v12 = vmul.f32 0.0625, %v582_v8  ;;  %v602_v13 = vadd.f32 %v601_v9, %v600_v5  ;;  %v575_v14 = vadd.f32 %v574_v10, %v573_v6  ;;  %v594_v16 = vrot.slane %v593_v11, 1  ;;  %v843_v5 = vld [vmem:[#allocation8 + $0x120] sm:$0xff]  ;;  %v840_v6 = vld [vmem:[#allocation8 + $0x108] sm:$0xff] }
 0x2f6   :  { %v2214_v7 = vcombine.high %v839_v4, %v843_v5  ;;  %v844_v8 = vld [vmem:[#allocation8 + $0x128] sm:$0xff]  ;;  %v2213_v9 = vcombine.low %v839_v4, %v843_v5 }
 0x2f7   :  { %v604_v18 = vmul.f32 0.0625, %v602_v13  ;;  %v606_v19 = vmul.f32 %v584_v12, %v584_v12  ;;  %v583_v20 = vmul.f32 0.0625, %v575_v14  ;;  %v595_v15 = vadd.f32 %v594_v16, %v593_v11  ;;  %v835_v13 = vld [vmem:[#allocation8 + $0xe0] sm:$0xff]  ;;  %v832_v14 = vld [vmem:[#allocation8 + $0xc8] sm:$0xff] }
 0x2f8   :  { %v618_v28 = vsub.f32 %v566_v45, %v584_v12  ;;  %v617_v31 = vsub.f32 %v563_v42, %v584_v12  ;;  %v864_v45 = vld [vmem:[#allocation8 + $0x1c8] sm:$0xff]  ;;  %v2238_v42 = vcombine.high %v863_v47, %v867_v48  ;;  %v2215_v10 = vcombine.low %v840_v6, %v844_v8  ;;  %v831_v12 = vld [vmem:[#allocation8 + $0xc0] sm:$0xff]  ;;  %v2662_v47 = vld [vmem:[#allocation8 + $0x1d0] sm:$0xff] }
 0x2f9   :  { %v608_v17 = vsub.f32 %v604_v18, %v606_v19  ;;  %v605_v21 = vmul.f32 %v583_v20, %v583_v20  ;;  %v603_v22 = vmul.f32 0.0625, %v595_v15  ;;  %v616_v32 = vsub.f32 %v558_v50, %v583_v20  ;;  %v836_v18 = vld [vmem:[#allocation8 + $0xe8] sm:$0xff]  ;;  %v2664_v48 = vld [vmem:[#allocation8 + $0x1f0] sm:$0xff] }
 0x2fa   :  { %v615_v30 = vsub.f32 %v555_v43, %v583_v20  ;;  %v2239_v52 = vcombine.low %v864_v45, %v868_v49  ;;  %v2240_v50 = vcombine.high %v864_v45, %v868_v49  ;;  %1235 = vmatprep.subr.bf16.mxu0 %v2238_v42  ;;  %v855_v43 = vld [vmem:[#allocation8 + $0x180] sm:$0xff]  ;;  %v2216_v11 = vcombine.high %v840_v6, %v844_v8  ;;  %v866_v45 = vld [vmem:[#allocation8 + $0x1d8] sm:$0xff] }
 0x2fb   :  { %v610_v23 = vmax.f32 %v608_v17, 0.0  ;;  %v607_v24 = vsub.f32 %v603_v22, %v605_v21  ;;  %1236 = vmatpush1.bf16.msra.mxu0 %v2237_v51  ;;  %v2230_v55 = vcombine.high %v855_v43, %v859_v53  ;;  %v2229_v57 = vcombine.low %v855_v43, %v859_v53  ;;  %v823_v17 = vld [vmem:[#allocation8 + $0x80] sm:$0xff]  ;;  %v824_v22 = vld [vmem:[#allocation8 + $0x88] sm:$0xff] }
 0x2fc   :  { %1288 = vmatprep.subr.bf16.mxu1 %v2240_v50  ;;  %v2206_v16 = vcombine.high %v831_v12, %v835_v13  ;;  %v2205_v19 = vcombine.low %v831_v12, %v835_v13  ;;  %v2207_v20 = vcombine.low %v832_v14, %v836_v18  ;;  %v2208_v15 = vcombine.high %v832_v14, %v836_v18  ;;  %v827_v21 = vld [vmem:[#allocation8 + $0xa0] sm:$0xff] }
 0x2fd   :  { %v612_v25 = vadd.f32 1e-05, %v610_v23  ;;  %v609_v26 = vmax.f32 %v607_v24, 0.0  ;;  %1237 = vmatprep.subr.bf16.mxu0 %v2230_v55  ;;  %v2198_v23 = vcombine.high %v823_v17, %v827_v21  ;;  %v828_v24 = vld [vmem:[#allocation8 + $0xa8] sm:$0xff]  ;;  %v2563_v42 = vmov 0  }
 0x2fe   :  { %1267 = vmatprep.mubr.bf16.mxu0 %v2563_v42  ;;  %v2241_v49 = vcombine.low %v2662_v47, %v2664_v48  ;;  %v2242_v51 = vcombine.high %v2662_v47, %v2664_v48  ;;  %v845_v47 = vld [vmem:[#allocation8 + $0x130] sm:$0xff]  ;;  %v842_v48 = vld [vmem:[#allocation8 + $0x118] sm:$0xff] }
 0x2ff   :  { %2407 = vrsqrt.f32 %v612_v25  ;;  %v611_v27 = vadd.f32 1e-05, %v609_v26  ;;  %1238 = vmatpush1.bf16.msra.mxu0 %v2229_v57  ;;  %v2197_v25 = vcombine.low %v823_v17, %v827_v21  ;;  %v2199_v26 = vcombine.low %v824_v22, %v828_v24 }
 0x300   :  { %1239 = vmatprep.subr.bf16.mxu0 %v2222_v63 }
 0x301   :  { %2409 = vrsqrt.f32 %v611_v27  ;;  %v2200_v27 = vcombine.high %v824_v22, %v828_v24 }
 0x303   :  { %1240 = vmatpush1.bf16.msra.mxu0 %v2221_v1 }
 0x304   :  { %1241 = vmatprep.subr.bf16.mxu0 %v2214_v7 }
 0x307   :  { %1242 = vmatpush1.bf16.msra.mxu0 %v2213_v9 }
 0x308   :  { %1243 = vmatprep.subr.bf16.mxu0 %v2206_v16 }
 0x30b   :  { %1244 = vmatpush1.bf16.msra.mxu0 %v2205_v19 }
 0x30c   :  { %v2408_v33 = vpop.eup %2407  ;;  %1245 = vmatprep.subr.bf16.mxu0 %v2198_v23 }
 0x30d   :  { %v622_v34 = vmul.f32 %v2408_v33, %v618_v28  ;;  %v621_v29 = vmul.f32 %v2408_v33, %v617_v31  ;;  %v815_v28 = vld [vmem:[#allocation8 + $0x40] sm:$0xff]  ;;  %v816_v33 = vld [vmem:[#allocation8 + $0x48] sm:$0xff] }
 0x30e   :  { %v2410_v35 = vpop.eup %2409  ;;  %v819_v31 = vld [vmem:[#allocation8 + $0x60] sm:$0xff] }
 0x30f   :  { %v619_v36 = vmul.f32 %v2410_v35, %v615_v30  ;;  %v620_v37 = vmul.f32 %v2410_v35, %v616_v32  ;;  %v626_v38 = vmax.f32 %v622_v34, 0.0  ;;  %v625_v39 = vmax.f32 %v621_v29, 0.0  ;;  %1246 = vmatpush1.bf16.msra.mxu0 %v2197_v25  ;;  %v820_v29 = vld [vmem:[#allocation8 + $0x68] sm:$0xff] }
 0x310   :  { %v2190_v34 = vcombine.high %v815_v28, %v819_v31  ;;  %v2189_v32 = vcombine.low %v815_v28, %v819_v31  ;;  %v2191_v30 = vcombine.low %v816_v33, %v820_v29  ;;  %v2192_v35 = vcombine.high %v816_v33, %v820_v29 }
 0x311   :  { %v623_v40 = vmax.f32 %v619_v36, 0.0  ;;  %v624_v41 = vmax.f32 %v620_v37, 0.0  ;;  %v644_v46 = vpack.c.bf16 %v626_v38, %v625_v39  ;;  %v807_v36 = vld [vmem:[#allocation8] sm:$0xff]  ;;  %v808_v38 = vld [vmem:[#allocation8 + $0x8] sm:$0xff] }
 0x312   :  { %1247 = vmatprep.subr.bf16.mxu0 %v2190_v34  ;;  %v811_v37 = vld [vmem:[#allocation8 + $0x20] sm:$0xff] }
 0x313   :  { %v643_v44 = vpack.c.bf16 %v624_v41, %v623_v40  ;;  %1248 = vmatpush1.bf16.msra.mxu0 %v2189_v32  ;;  %v2182_v39 = vcombine.high %v807_v36, %v811_v37  ;;  %v812_v40 = vld [vmem:[#allocation8 + $0x28] sm:$0xff]  ;;  %v2181_v41 = vcombine.low %v807_v36, %v811_v37 }
 0x315   :  { %2344 = vmatprep.mubr.bf16.mxu1 %v643_v44  ;;  %v2183_v44 = vcombine.low %v808_v38, %v812_v40  ;;  %1249 = vmatprep.subr.bf16.mxu0 %v2182_v39 }
 0x316   :  { %2345 = vmatmul.mubr.bf16.vlgmr.msra.gmra.mxu1 %v644_v46  ;;  %v2184_v46 = vcombine.high %v808_v38, %v812_v40 }
 0x317   :  { %1289 = vmatpush1.bf16.msra.mxu1 %v2239_v52  ;;  %1250 = vmatpush1.bf16.msra.mxu0 %v2181_v41  ;;  %v870_v52 = vld [vmem:[#allocation8 + $0x1f8] sm:$0xff] }
 0x318   :  { %1290 = vmatprep.subr.bf16.mxu1 %v2232_v59  ;;  %1320 = vmatprep.mubr.bf16.mxu1 %v2563_v42  ;;  %v2672_v50 = vcombine.low %v866_v45, %v870_v52  ;;  %v2674_v43 = vcombine.high %v866_v45, %v870_v52 }
 0x319   :  { %1341 = vmatprep.subr.bf16.mxu0 %v2242_v51 }
 0x31b   :  { %1291 = vmatpush1.bf16.msra.mxu1 %v2231_v58 }
 0x31c   :  { %1292 = vmatprep.subr.bf16.mxu1 %v2224_v3 }
 0x31f   :  { %1293 = vmatpush1.bf16.msra.mxu1 %v2223_v2 }
 0x320   :  { %1294 = vmatprep.subr.bf16.mxu1 %v2216_v11 }
 0x323   :  { %1295 = vmatpush1.bf16.msra.mxu1 %v2215_v10 }
 0x324   :  { %1296 = vmatprep.subr.bf16.mxu1 %v2208_v15 }
 0x327   :  { %1297 = vmatpush1.bf16.msra.mxu1 %v2207_v20 }
 0x328   :  { %1298 = vmatprep.subr.bf16.mxu1 %v2200_v27 }
 0x32b   :  { %1299 = vmatpush1.bf16.msra.mxu1 %v2199_v26 }
 0x32c   :  { %1300 = vmatprep.subr.bf16.mxu1 %v2192_v35 }
 0x32f   :  { %1301 = vmatpush1.bf16.msra.mxu1 %v2191_v30 }
 0x330   :  { %1302 = vmatprep.subr.bf16.mxu1 %v2184_v46 }
 0x333   :  { %1303 = vmatpush1.bf16.msra.mxu1 %v2183_v44 }
 0x334   :  { %2348 = vmatprep.subr.bf16.mxu1 %v2674_v43 }
 0x3d6   :  { %v2346_v53 = vpop.f32.mrf.mxu1 }
 0x3d7   :  { %v2680_v56 = vadd.f32 %v2346_v53, %v2172_v54  ;;  %v857_v53 = vld [vmem:[#allocation8 + $0x190] sm:$0xff] }
 0x3d8   :  { %v734_v55 = vpop.f32.mrf.mxu1 }
 0x3d9   :  { %v735_v57 = vadd.f32 %v2172_v54, %v734_v55  ;;  %v767_v61 = vmul.f32 %v2680_v56, %v2680_v56 }
 0x3da   :  { %v2347_v58 = vpop.f32.mrf.mxu1 }
 0x3db   :  { %v2682_v59 = vadd.f32 %v2347_v58, %v2172_v54  ;;  %v765_v1 = vmul.f32 %v735_v57, %v735_v57  ;;  %v858_v58 = vld [vmem:[#allocation8 + $0x198] sm:$0xff] }
 0x3dc   :  { %v737_v60 = vpop.f32.mrf.mxu1 }
 0x3dd   :  { %v756_v62 = vadd.f32 %v2682_v59, %v2680_v56  ;;  %v768_v63 = vmul.f32 %v2682_v59, %v2682_v59  ;;  %v738_v0 = vadd.f32 %v2172_v54, %v737_v60  ;;  %v861_v54 = vld [vmem:[#allocation8 + $0x1b0] sm:$0xff]  ;;  %v862_v60 = vld [vmem:[#allocation8 + $0x1b8] sm:$0xff] }
 0x3df   :  { %v757_v2 = vrot.slane %v756_v62, 4  ;;  %v776_v3 = vadd.f32 %v768_v63, %v767_v61  ;;  %v749_v4 = vadd.f32 %v738_v0, %v735_v57  ;;  %v766_v5 = vmul.f32 %v738_v0, %v738_v0 }
 0x3e1   :  { %v758_v6 = vadd.f32 %v757_v2, %v756_v62  ;;  %v777_v7 = vrot.slane %v776_v3, 4  ;;  %v750_v8 = vrot.slane %v749_v4, 4  ;;  %v769_v9 = vadd.f32 %v766_v5, %v765_v1 }
 0x3e2   :  { %v2234_v2 = vcombine.high %v857_v53, %v861_v54 }
 0x3e3   :  { %v759_v10 = vrot.slane %v758_v6, 2  ;;  %v778_v11 = vadd.f32 %v777_v7, %v776_v3  ;;  %v751_v12 = vadd.f32 %v750_v8, %v749_v4  ;;  %v770_v13 = vrot.slane %v769_v9, 4  ;;  %v850_v7 = vld [vmem:[#allocation8 + $0x158] sm:$0xff] }
 0x3e4   :  { %v854_v8 = vld [vmem:[#allocation8 + $0x178] sm:$0xff] }
 0x3e5   :  { %v760_v14 = vadd.f32 %v759_v10, %v758_v6  ;;  %v779_v16 = vrot.slane %v778_v11, 2  ;;  %v752_v18 = vrot.slane %v751_v12, 2  ;;  %v771_v19 = vadd.f32 %v770_v13, %v769_v9  ;;  %v853_v6 = vld [vmem:[#allocation8 + $0x170] sm:$0xff] }
 0x3e6   :  { %v841_v13 = vld [vmem:[#allocation8 + $0x110] sm:$0xff] }
 0x3e7   :  { %v761_v20 = vrot.slane %v760_v14, 1  ;;  %v780_v15 = vadd.f32 %v779_v16, %v778_v11  ;;  %v753_v17 = vadd.f32 %v752_v18, %v751_v12  ;;  %v772_v21 = vrot.slane %v771_v19, 2 }
 0x3e8   :  { %v2705_v11 = vcombine.high %v850_v7, %v854_v8  ;;  %v2710_v16 = vcombine.low %v850_v7, %v854_v8 }
 0x3e9   :  { %v762_v22 = vadd.f32 %v761_v20, %v760_v14  ;;  %v781_v23 = vrot.slane %v780_v15, 1  ;;  %v754_v24 = vrot.slane %v753_v17, 1  ;;  %v773_v25 = vadd.f32 %v772_v21, %v771_v19  ;;  %v834_v21 = vld [vmem:[#allocation8 + $0xd8] sm:$0xff] }
 0x3ea   :  { %v2218_v19 = vcombine.high %v841_v13, %v845_v47 }
 0x3eb   :  { %v764_v26 = vmul.f32 0.0625, %v762_v22  ;;  %v782_v27 = vadd.f32 %v781_v23, %v780_v15  ;;  %v755_v28 = vadd.f32 %v754_v24, %v753_v17  ;;  %v774_v31 = vrot.slane %v773_v25, 1  ;;  %v833_v15 = vld [vmem:[#allocation8 + $0xd0] sm:$0xff]  ;;  %v838_v22 = vld [vmem:[#allocation8 + $0xf8] sm:$0xff] }
 0x3ec   :  { %v837_v17 = vld [vmem:[#allocation8 + $0xf0] sm:$0xff]  ;;  %v2217_v23 = vcombine.low %v841_v13, %v845_v47 }
 0x3ed   :  { %v784_v33 = vmul.f32 0.0625, %v782_v27  ;;  %v786_v34 = vmul.f32 %v764_v26, %v764_v26  ;;  %v763_v29 = vmul.f32 0.0625, %v755_v28  ;;  %v775_v32 = vadd.f32 %v774_v31, %v773_v25  ;;  %v825_v27 = vld [vmem:[#allocation8 + $0x90] sm:$0xff]  ;;  %v826_v31 = vld [vmem:[#allocation8 + $0x98] sm:$0xff] }
 0x3ee   :  { %v798_v61 = vsub.f32 %v2682_v59, %v764_v26  ;;  %v797_v1 = vsub.f32 %v2680_v56, %v764_v26  ;;  %v2233_v56 = vcombine.low %v857_v53, %v861_v54  ;;  %v2702_v59 = vcombine.low %v858_v58, %v862_v60  ;;  %v829_v28 = vld [vmem:[#allocation8 + $0xb0] sm:$0xff] }
 0x3ef   :  { %v788_v30 = vsub.f32 %v784_v33, %v786_v34  ;;  %v785_v35 = vmul.f32 %v763_v29, %v763_v29  ;;  %v783_v36 = vmul.f32 0.0625, %v775_v32  ;;  %v796_v44 = vsub.f32 %v738_v0, %v763_v29  ;;  %v830_v33 = vld [vmem:[#allocation8 + $0xb8] sm:$0xff] }
 0x3f0   :  { %v795_v46 = vsub.f32 %v735_v57, %v763_v29  ;;  %v2694_v0 = vcombine.high %v858_v58, %v862_v60  ;;  %v849_v57 = vld [vmem:[#allocation8 + $0x150] sm:$0xff]  ;;  %v2210_v25 = vcombine.high %v833_v15, %v837_v17  ;;  %v2212_v26 = vcombine.high %v834_v21, %v838_v22 }
 0x3f1   :  { %v790_v37 = vmax.f32 %v788_v30, 0.0  ;;  %v787_v38 = vsub.f32 %v783_v36, %v785_v35  ;;  %v2226_v10 = vcombine.high %v849_v57, %v853_v6  ;;  %v2225_v14 = vcombine.low %v849_v57, %v853_v6  ;;  %v817_v35 = vld [vmem:[#allocation8 + $0x50] sm:$0xff] }
 0x3f2   :  { %v2209_v34 = vcombine.low %v833_v15, %v837_v17  ;;  %v2211_v29 = vcombine.low %v834_v21, %v838_v22  ;;  %v2202_v32 = vcombine.high %v825_v27, %v829_v28  ;;  %v2204_v30 = vcombine.high %v826_v31, %v830_v33  ;;  %v821_v36 = vld [vmem:[#allocation8 + $0x70] sm:$0xff] }
 0x3f3   :  { %v789_v39 = vmax.f32 %v787_v38, 0.0  ;;  %v792_v40 = vadd.f32 1e-05, %v790_v37  ;;  %v818_v37 = vld [vmem:[#allocation8 + $0x58] sm:$0xff]  ;;  %v2193_v53 = vcombine.low %v817_v35, %v821_v36 }
 0x3f4   :  { %v822_v38 = vld [vmem:[#allocation8 + $0x78] sm:$0xff] }
 0x3f5   :  { %v791_v41 = vadd.f32 1e-05, %v789_v39  ;;  %v2201_v39 = vcombine.low %v825_v27, %v829_v28  ;;  %v2195_v54 = vcombine.low %v818_v37, %v822_v38 }
 0x3f7   :  { %2411 = vrsqrt.f32 %v791_v41  ;;  %v2194_v41 = vcombine.high %v817_v35, %v821_v36 }
 0x3f8   :  { %2413 = vrsqrt.f32 %v792_v40  ;;  %v2203_v40 = vcombine.low %v826_v31, %v830_v33 }
 0x404   :  { %v2412_v45 = vpop.eup %2411 }
 0x405   :  { %v800_v51 = vmul.f32 %v2412_v45, %v796_v44  ;;  %v799_v52 = vmul.f32 %v2412_v45, %v795_v46  ;;  %v2414_v55 = vpop.eup %2413  ;;  %v2196_v44 = vcombine.high %v818_v37, %v822_v38  ;;  %v809_v46 = vld [vmem:[#allocation8 + $0x10] sm:$0xff] }
 0x406   :  { %v802_v3 = vmul.f32 %v2414_v55, %v798_v61  ;;  %v801_v5 = vmul.f32 %v2414_v55, %v797_v1  ;;  %v813_v45 = vld [vmem:[#allocation8 + $0x30] sm:$0xff] }
 0x407   :  { %v804_v62 = vmax.f32 %v800_v51, 0.0  ;;  %v803_v63 = vmax.f32 %v799_v52, 0.0  ;;  %v810_v51 = vld [vmem:[#allocation8 + $0x18] sm:$0xff]  ;;  %v2186_v55 = vcombine.high %v809_v46, %v813_v45  ;;  %v2185_v60 = vcombine.low %v809_v46, %v813_v45 }
 0x408   :  { %v806_v9 = vmax.f32 %v802_v3, 0.0  ;;  %v805_v12 = vmax.f32 %v801_v5, 0.0  ;;  %v814_v52 = vld [vmem:[#allocation8 + $0x38] sm:$0xff] }
 0x409   :  { %v2692_v4 = vpack.c.bf16 %v804_v62, %v803_v63  ;;  %v2188_v58 = vcombine.high %v810_v51, %v814_v52  ;;  %v2187_v61 = vcombine.low %v810_v51, %v814_v52  ;;  %v2743_v63 = vld [vmem:[%s3173_s10] sm:$0xff]  ;;  %s2565_s10 = smov [#allocation10]  }
 0x40a   :  { %v2713_v18 = vpack.c.bf16 %v806_v9, %v805_v12  ;;  %s2137_s13 = sshll.u32 %s2565_s10, 4  ;;  %s2138_s13 = int_to_ptr.vmem [resolvable:$true] %s2137_s13 }
 0x40b   :  { %1268 = vmatmul.mubr.bf16.vlgmr.msra.gmra.mxu0 %v2692_v4  ;;  %1321 = vmatmul.mubr.bf16.vlgmr.msra.gmra.mxu1 %v2692_v4  ;;  %s2527_s14 = scalar_lea.vmem %s2138_s13, 256  ;;  %p2532_p7 = scmp.lt.s32.totalorder %s2138_s13, %s2138_s13 }
 0x40c   :  { %1342 = vmatpush1.bf16.msra.mxu0 %v2241_v49  ;;  %2356 = vmatpush1.bf16.msra.mxu1 %v2672_v50  ;;  %v846_v49 = vld [vmem:[#allocation8 + $0x138] sm:$0xff]  ;;  %p2528_p6 = scmp.ne.s32.totalorder %s2138_s13, %s2527_s14  ;;  %p2533_p8 = scmp.lt.s32.totalorder %s2527_s14, %s2527_s14 }
 0x40d   :  { %1343 = vmatprep.subr.bf16.mxu0 %v2234_v2  ;;  %2349 = vmatprep.subr.bf16.mxu1 %v2694_v0  ;;  %v2715_v20 = vcombine.high %v842_v48, %v846_v49  ;;  %v2219_v24 = vcombine.low %v842_v48, %v846_v49 }
 0x40e   :  { %1277 = vmatprep.mubr.bf16.mxu0 %v2563_v42  ;;  %1330 = vmatprep.mubr.bf16.mxu1 %v2563_v42  ;;  %p2534_p9 = por %p2533_p8, %p2532_p7 }
 0x410   :  { %1344 = vmatpush1.bf16.msra.mxu0 %v2233_v56  ;;  %2357 = vmatpush1.bf16.msra.mxu1 %v2702_v59  ;;  %p2535_p10 = pnand %p2534_p9, %p2528_p6 }
 0x411   :  { %1345 = vmatprep.subr.bf16.mxu0 %v2226_v10  ;;  %2350 = vmatprep.subr.bf16.mxu1 %v2705_v11 }
 0x413   :  { %1278 = vmatmul.mubr.bf16.gmra.mxu0 %v2713_v18  ;;  %1331 = vmatmul.mubr.bf16.gmra.mxu1 %v2713_v18 }
 0x414   :  { %1346 = vmatpush1.bf16.msra.mxu0 %v2225_v14  ;;  %2358 = vmatpush1.bf16.msra.mxu1 %v2710_v16 }
 0x415   :  { %1347 = vmatprep.subr.bf16.mxu0 %v2218_v19  ;;  %2351 = vmatprep.subr.bf16.mxu1 %v2715_v20 }
 0x416   :  { %1373 = vmatprep.mubr.bf16.mxu0 %v2563_v42  ;;  %1436 = vmatprep.mubr.bf16.mxu1 %v2563_v42 }
 0x418   :  { %1348 = vmatpush1.bf16.msra.mxu0 %v2217_v23  ;;  %2359 = vmatpush1.bf16.msra.mxu1 %v2219_v24 }
 0x419   :  { %1349 = vmatprep.subr.bf16.mxu0 %v2210_v25  ;;  %2352 = vmatprep.subr.bf16.mxu1 %v2212_v26 }
 0x41c   :  { %1350 = vmatpush1.bf16.msra.mxu0 %v2209_v34  ;;  %2360 = vmatpush1.bf16.msra.mxu1 %v2211_v29 }
 0x41d   :  { %1351 = vmatprep.subr.bf16.mxu0 %v2202_v32  ;;  %2353 = vmatprep.subr.bf16.mxu1 %v2204_v30 }
 0x420   :  { %1352 = vmatpush1.bf16.msra.mxu0 %v2201_v39  ;;  %2361 = vmatpush1.bf16.msra.mxu1 %v2203_v40 }
 0x421   :  { %1353 = vmatprep.subr.bf16.mxu0 %v2194_v41  ;;  %2354 = vmatprep.subr.bf16.mxu1 %v2196_v44 }
 0x424   :  { %1354 = vmatpush1.bf16.msra.mxu0 %v2193_v53  ;;  %2362 = vmatpush1.bf16.msra.mxu1 %v2195_v54 }
 0x425   :  { %1355 = vmatprep.subr.bf16.mxu0 %v2186_v55  ;;  %2355 = vmatprep.subr.bf16.mxu1 %v2188_v58 }
 0x428   :  { %1356 = vmatpush1.bf16.msra.mxu0 %v2185_v60  ;;  %2363 = vmatpush1.bf16.msra.mxu1 %v2187_v61 }
 0x429   :  { %1394 = vmatprep.subr.bf16.mxu0 %v2674_v43 }
 0x42b   :  { %1374 = vmatmul.mubr.bf16.vlgmr.msra.gmra.mxu0 %v2692_v4  ;;  %1437 = vmatmul.mubr.bf16.vlgmr.msra.gmra.mxu1 %v2713_v18 }
 0x42c   :  { %1395 = vmatpush1.bf16.msra.mxu0 %v2672_v50  ;;  %1383 = vmatprep.mubr.bf16.mxu0 %v2563_v42  ;;  %v875_v50 = vlaneseq }
 0x42d   :  { %1396 = vmatprep.subr.bf16.mxu0 %v2694_v0 }
 0x42e   :  { %v2736_v43 = vshrl.u32 %v875_v50, 7 }
 0x430   :  { %1397 = vmatpush1.bf16.msra.mxu0 %v2702_v59  ;;  %v877_v62 = vsub.s32 0, %v2736_v43  ;;  %v881_v1 = vsub.s32 1, %v2736_v43  ;;  %v889_v2 = vsub.s32 3, %v2736_v43 }
 0x431   :  { %1398 = vmatprep.subr.bf16.mxu0 %v2705_v11 }
 0x432   :  { %v2748_v3 = vrot.slane %v2743_v63, %v877_v62  ;;  %v2754_v5 = vrot.slane %v2743_v63, %v881_v1  ;;  %v2757_v6 = vrot.slane %v2743_v63, %v889_v2 }
 0x433   :  { %1384 = vmatmul.mubr.bf16.gmra.mxu0 %v2713_v18 }
 0x434   :  { %1399 = vmatpush1.bf16.msra.mxu0 %v2710_v16  ;;  %1426 = vmatprep.mubr.bf16.mxu0 %v2563_v42  ;;  %v885_v42 = vsub.s32 2, %v2736_v43 }
 0x435   :  { %1400 = vmatprep.subr.bf16.mxu0 %v2715_v20 }
 0x438   :  { %1401 = vmatpush1.bf16.msra.mxu0 %v2219_v24 }
 0x439   :  { %1402 = vmatprep.subr.bf16.mxu0 %v2212_v26 }
 0x43c   :  { %1403 = vmatpush1.bf16.msra.mxu0 %v2211_v29 }
 0x43d   :  { %1404 = vmatprep.subr.bf16.mxu0 %v2204_v30 }
 0x440   :  { %1405 = vmatpush1.bf16.msra.mxu0 %v2203_v40 }
 0x441   :  { %1406 = vmatprep.subr.bf16.mxu0 %v2196_v44 }
 0x444   :  { %1407 = vmatpush1.bf16.msra.mxu0 %v2195_v54 }
 0x445   :  { %1408 = vmatprep.subr.bf16.mxu0 %v2188_v58 }
 0x448   :  { %1409 = vmatpush1.bf16.msra.mxu0 %v2187_v61 }
 0x44b   :  { %1427 = vmatmul.mubr.bf16.vlgmr.msra.gmra.mxu0 %v2692_v4  ;;  %v2751_v4 = vrot.slane %v2743_v63, %v885_v42 }
 0x4cb   :  { %v1269_v0 = vpop.f32.mrf.mxu0  ;;  %v1322_v57 = vpop.f32.mrf.mxu1 }
 0x4cc   :  { %v2760_v7 = vadd.f32 %v1269_v0, %v2748_v3  ;;  %v2763_v8 = vadd.f32 %v1322_v57, %v2751_v4 }
 0x4cd   :  { %v1271_v56 = vpop.f32.mrf.mxu0  ;;  %v1324_v59 = vpop.f32.mrf.mxu1 }
 0x4ce   :  { %v2766_v9 = vadd.f32 %v1271_v56, %v2754_v5  ;;  %v2769_v10 = vadd.f32 %v1324_v59, %v2757_v6  ;;  %v1575_v48 = vmul.f32 %v2760_v7, %v2760_v7  ;;  %v1577_v49 = vmul.f32 %v2763_v8, %v2763_v8 }
 0x4cf   :  { %v1273_v11 = vpop.f32.mrf.mxu0  ;;  %v1326_v12 = vpop.f32.mrf.mxu1 }
 0x4d0   :  { %v2772_v13 = vadd.f32 %v1273_v11, %v2748_v3  ;;  %v2775_v47 = vadd.f32 %v1326_v12, %v2751_v4  ;;  %v1576_v17 = vmul.f32 %v2766_v9, %v2766_v9  ;;  %v1578_v21 = vmul.f32 %v2769_v10, %v2769_v10 }
 0x4d1   :  { %v1275_v14 = vpop.f32.mrf.mxu0  ;;  %v1328_v16 = vpop.f32.mrf.mxu1 }
 0x4d2   :  { %v1447_v18 = vadd.f32 %v2772_v13, %v2760_v7  ;;  %v1583_v19 = vmul.f32 %v2772_v13, %v2772_v13  ;;  %v1461_v20 = vadd.f32 %v2775_v47, %v2763_v8  ;;  %v1585_v15 = vmul.f32 %v2775_v47, %v2775_v47 }
 0x4d3   :  { %v2794_v22 = vadd.f32 %v1275_v14, %v2754_v5  ;;  %v2797_v23 = vadd.f32 %v1328_v16, %v2757_v6 }
 0x4d4   :  { %v1448_v24 = vrot.slane %v1447_v18, 4  ;;  %v1607_v25 = vadd.f32 %v1583_v19, %v1575_v48  ;;  %v1462_v26 = vrot.slane %v1461_v20, 4  ;;  %v1621_v27 = vadd.f32 %v1585_v15, %v1577_v49  ;;  %v1279_v48 = vpop.f32.mrf.mxu0 }
 0x4d5   :  { %v1454_v28 = vadd.f32 %v2794_v22, %v2766_v9  ;;  %v1584_v31 = vmul.f32 %v2794_v22, %v2794_v22  ;;  %v1468_v33 = vadd.f32 %v2797_v23, %v2769_v10  ;;  %v1586_v34 = vmul.f32 %v2797_v23, %v2797_v23 }
 0x4d6   :  { %v1449_v29 = vadd.f32 %v1448_v24, %v1447_v18  ;;  %v1608_v32 = vrot.slane %v1607_v25, 4  ;;  %v1463_v30 = vadd.f32 %v1462_v26, %v1461_v20  ;;  %v1622_v35 = vrot.slane %v1621_v27, 4 }
 0x4d7   :  { %v1455_v36 = vrot.slane %v1454_v28, 4  ;;  %v1614_v37 = vadd.f32 %v1584_v31, %v1576_v17  ;;  %v1469_v38 = vrot.slane %v1468_v33, 4  ;;  %v1628_v39 = vadd.f32 %v1586_v34, %v1578_v21 }
 0x4d8   :  { %v1450_v40 = vrot.slane %v1449_v29, 2  ;;  %v1609_v41 = vadd.f32 %v1608_v32, %v1607_v25  ;;  %v1464_v44 = vrot.slane %v1463_v30, 2  ;;  %v1623_v46 = vadd.f32 %v1622_v35, %v1621_v27  ;;  %v1332_v27 = vpop.f32.mrf.mxu1 }
 0x4d9   :  { %v1456_v45 = vadd.f32 %v1455_v36, %v1454_v28  ;;  %v1615_v51 = vrot.slane %v1614_v37, 4  ;;  %v1470_v52 = vadd.f32 %v1469_v38, %v1468_v33  ;;  %v1629_v53 = vrot.slane %v1628_v39, 4 }
 0x4da   :  { %v1451_v54 = vadd.f32 %v1450_v40, %v1449_v29  ;;  %v1610_v55 = vrot.slane %v1609_v41, 2  ;;  %v1465_v58 = vadd.f32 %v1464_v44, %v1463_v30  ;;  %v1624_v60 = vrot.slane %v1623_v46, 2  ;;  %v1281_v29 = vpop.f32.mrf.mxu0 }
 0x4db   :  { %v1457_v61 = vrot.slane %v1456_v45, 2  ;;  %v1616_v50 = vadd.f32 %v1615_v51, %v1614_v37  ;;  %v1471_v62 = vrot.slane %v1470_v52, 2  ;;  %v1630_v42 = vadd.f32 %v1629_v53, %v1628_v39 }
 0x4dc   :  { %v1452_v1 = vrot.slane %v1451_v54, 1  ;;  %v1611_v2 = vadd.f32 %v1610_v55, %v1609_v41  ;;  %v1466_v0 = vrot.slane %v1465_v58, 1  ;;  %v1625_v57 = vadd.f32 %v1624_v60, %v1623_v46  ;;  %v1334_v41 = vpop.f32.mrf.mxu1 }
 0x4dd   :  { %v1458_v56 = vadd.f32 %v1457_v61, %v1456_v45  ;;  %v1617_v59 = vrot.slane %v1616_v50, 2  ;;  %v1472_v11 = vadd.f32 %v1471_v62, %v1470_v52  ;;  %v1631_v12 = vrot.slane %v1630_v42, 2  ;;  %v1283_v45 = vpop.f32.mrf.mxu0 }
 0x4de   :  { %v1453_v49 = vadd.f32 %v1452_v1, %v1451_v54  ;;  %v1612_v14 = vrot.slane %v1611_v2, 1  ;;  %v1467_v16 = vadd.f32 %v1466_v0, %v1465_v58  ;;  %v1626_v18 = vrot.slane %v1625_v57, 1  ;;  %v1336_v62 = vpop.f32.mrf.mxu1 }
 0x4df   :  { %v1459_v19 = vrot.slane %v1458_v56, 1  ;;  %v1618_v20 = vadd.f32 %v1617_v59, %v1616_v50  ;;  %v1473_v15 = vrot.slane %v1472_v11, 1  ;;  %v1632_v17 = vadd.f32 %v1631_v12, %v1630_v42  ;;  %v1285_v1 = vpop.f32.mrf.mxu0 }
 0x4e0   :  { %v2807_v21 = vmul.f32 0.0625, %v1453_v49  ;;  %v1613_v24 = vadd.f32 %v1612_v14, %v1611_v2  ;;  %v2809_v25 = vmul.f32 0.0625, %v1467_v16  ;;  %v1627_v26 = vadd.f32 %v1626_v18, %v1625_v57 }
 0x4e1   :  { %v1460_v28 = vadd.f32 %v1459_v19, %v1458_v56  ;;  %v1619_v31 = vrot.slane %v1618_v20, 1  ;;  %v1474_v33 = vadd.f32 %v1473_v15, %v1472_v11  ;;  %v1633_v34 = vrot.slane %v1632_v17, 1 }
 0x4e2   :  { %v1719_v32 = vmul.f32 0.0625, %v1613_v24  ;;  %v1735_v30 = vmul.f32 %v2807_v21, %v2807_v21  ;;  %v1721_v35 = vmul.f32 0.0625, %v1627_v26  ;;  %v1737_v36 = vmul.f32 %v2809_v25, %v2809_v25 }
 0x4e3   :  { %v2815_v38 = vmul.f32 0.0625, %v1460_v28  ;;  %v1620_v39 = vadd.f32 %v1619_v31, %v1618_v20  ;;  %v2817_v40 = vmul.f32 0.0625, %v1474_v33  ;;  %v1634_v46 = vadd.f32 %v1633_v34, %v1632_v17 }
 0x4e4   :  { %v1751_v37 = vsub.f32 %v1719_v32, %v1735_v30  ;;  %v1753_v44 = vsub.f32 %v1721_v35, %v1737_v36  ;;  %v2824_v61 = vadd.f32 %v1279_v48, %v2748_v3  ;;  %v2827_v50 = vadd.f32 %v1332_v27, %v2751_v4 }
 0x4e5   :  { %v1720_v52 = vmul.f32 0.0625, %v1620_v39  ;;  %v1736_v53 = vmul.f32 %v2815_v38, %v2815_v38  ;;  %v1722_v55 = vmul.f32 0.0625, %v1634_v46  ;;  %v1738_v58 = vmul.f32 %v2817_v40, %v2817_v40 }
 0x4e6   :  { %v1767_v51 = vmax.f32 %v1751_v37, 0.0  ;;  %v1769_v54 = vmax.f32 %v1753_v44, 0.0  ;;  %v2830_v56 = vadd.f32 %v1283_v45, %v2748_v3  ;;  %v2833_v59 = vadd.f32 %v1336_v62, %v2751_v4 }
 0x4e7   :  { %v1752_v60 = vsub.f32 %v1720_v52, %v1736_v53  ;;  %v1754_v0 = vsub.f32 %v1722_v55, %v1738_v58  ;;  %v1591_v11 = vmul.f32 %v2824_v61, %v2824_v61  ;;  %v1593_v12 = vmul.f32 %v2827_v50, %v2827_v50  ;;  %v1338_v52 = vpop.f32.mrf.mxu1 }
 0x4e8   :  { %v1783_v42 = vadd.f32 1e-05, %v1767_v51  ;;  %v1785_v2 = vadd.f32 1e-05, %v1769_v54  ;;  %v2840_v48 = vadd.f32 %v1281_v29, %v2754_v5  ;;  %v2843_v49 = vadd.f32 %v1285_v1, %v2754_v5 }
 0x4e9   :  { %v1768_v57 = vmax.f32 %v1752_v60, 0.0  ;;  %v1503_v3 = vadd.f32 %v2830_v56, %v2824_v61  ;;  %v1599_v4 = vmul.f32 %v2830_v56, %v2830_v56  ;;  %v1517_v14 = vadd.f32 %v2833_v59, %v2827_v50 }
 0x4ea   :  { %2415 = vrsqrt.f32 %v1783_v42  ;;  %v1770_v16 = vmax.f32 %v1754_v0, 0.0  ;;  %v1601_v18 = vmul.f32 %v2833_v59, %v2833_v59  ;;  %v1510_v19 = vadd.f32 %v2843_v49, %v2840_v48 }
 0x4eb   :  { %2417 = vrsqrt.f32 %v1785_v2  ;;  %v1784_v5 = vadd.f32 1e-05, %v1768_v57  ;;  %v1504_v20 = vrot.slane %v1503_v3, 4  ;;  %v1663_v15 = vadd.f32 %v1599_v4, %v1591_v11 }
 0x4ec   :  { %v1518_v17 = vrot.slane %v1517_v14, 4  ;;  %v1677_v24 = vadd.f32 %v1601_v18, %v1593_v12  ;;  %v1511_v26 = vrot.slane %v1510_v19, 4  ;;  %v1600_v27 = vmul.f32 %v2843_v49, %v2843_v49 }
 0x4ed   :  { %v1505_v28 = vadd.f32 %v1504_v20, %v1503_v3  ;;  %v1664_v31 = vrot.slane %v1663_v15, 4  ;;  %v1786_v34 = vadd.f32 1e-05, %v1770_v16  ;;  %v1592_v29 = vmul.f32 %v2840_v48, %v2840_v48 }
 0x4ee   :  { %v1519_v33 = vadd.f32 %v1518_v17, %v1517_v14  ;;  %v1678_v32 = vrot.slane %v1677_v24, 4  ;;  %2419 = vrsqrt.f32 %v1784_v5  ;;  %v1512_v39 = vadd.f32 %v1511_v26, %v1510_v19 }
 0x4ef   :  { %v1506_v30 = vrot.slane %v1505_v28, 2  ;;  %v1665_v35 = vadd.f32 %v1664_v31, %v1663_v15  ;;  %v1670_v44 = vadd.f32 %v1600_v27, %v1592_v29  ;;  %2421 = vrsqrt.f32 %v1786_v34 }
 0x4f0   :  { %v1520_v36 = vrot.slane %v1519_v33, 2  ;;  %v1679_v37 = vadd.f32 %v1678_v32, %v1677_v24  ;;  %v2860_v54 = vadd.f32 %v1334_v41, %v2757_v6  ;;  %v1513_v60 = vrot.slane %v1512_v39, 2 }
 0x4f1   :  { %v1507_v46 = vadd.f32 %v1506_v30, %v1505_v28  ;;  %v1666_v45 = vrot.slane %v1665_v35, 2  ;;  %v1671_v62 = vrot.slane %v1670_v44, 4  ;;  %v2863_v42 = vadd.f32 %v1338_v52, %v2757_v6 }
 0x4f2   :  { %v1521_v51 = vadd.f32 %v1520_v36, %v1519_v33  ;;  %v1680_v53 = vrot.slane %v1679_v37, 2  ;;  %v1815_v12 = vsub.f32 %v2760_v7, %v2807_v21  ;;  %v1823_v3 = vsub.f32 %v2772_v13, %v2807_v21 }
 0x4f3   :  { %v1508_v55 = vrot.slane %v1507_v46, 1  ;;  %v1667_v58 = vadd.f32 %v1666_v45, %v1665_v35  ;;  %v1817_v41 = vsub.f32 %v2763_v8, %v2809_v25  ;;  %v1825_v14 = vsub.f32 %v2775_v47, %v2809_v25 }
 0x4f4   :  { %v1522_v0 = vrot.slane %v1521_v51, 1  ;;  %v1681_v57 = vadd.f32 %v1680_v53, %v1679_v37  ;;  %v1594_v6 = vmul.f32 %v2860_v54, %v2860_v54  ;;  %v1514_v19 = vadd.f32 %v1513_v60, %v1512_v39 }
 0x4f5   :  { %v1509_v1 = vadd.f32 %v1508_v55, %v1507_v46  ;;  %v1668_v2 = vrot.slane %v1667_v58, 1  ;;  %v1672_v5 = vadd.f32 %v1671_v62, %v1670_v44  ;;  %v1524_v7 = vadd.f32 %v2863_v42, %v2860_v54  ;;  %v1375_v46 = vpop.f32.mrf.mxu0 }
 0x4f6   :  { %v1602_v13 = vmul.f32 %v2863_v42, %v2863_v42  ;;  %v1523_v20 = vadd.f32 %v1522_v0, %v1521_v51  ;;  %v1682_v15 = vrot.slane %v1681_v57, 1  ;;  %v1816_v26 = vsub.f32 %v2766_v9, %v2815_v38  ;;  %v1438_v0 = vpop.f32.mrf.mxu1 }
 0x4f7   :  { %v2416_v11 = vpop.eup %2415  ;;  %v2875_v16 = vmul.f32 0.0625, %v1509_v1  ;;  %v1669_v18 = vadd.f32 %v1668_v2, %v1667_v58  ;;  %v1824_v28 = vsub.f32 %v2794_v22, %v2815_v38  ;;  %v1515_v31 = vrot.slane %v1514_v19, 1 }
 0x4f8   :  { %v2418_v4 = vpop.eup %2417  ;;  %v1847_v21 = vmul.f32 %v2416_v11, %v1815_v12  ;;  %v1855_v17 = vmul.f32 %v2416_v11, %v1823_v3  ;;  %v1525_v33 = vrot.slane %v1524_v7, 4  ;;  %v1684_v34 = vadd.f32 %v1602_v13, %v1594_v6 }
 0x4f9   :  { %v1727_v8 = vmul.f32 0.0625, %v1669_v18  ;;  %v1849_v47 = vmul.f32 %v2418_v4, %v1817_v41  ;;  %v1857_v25 = vmul.f32 %v2418_v4, %v1825_v14  ;;  %v1743_v24 = vmul.f32 %v2875_v16, %v2875_v16 }
 0x4fa   :  { %v2887_v32 = vmul.f32 0.0625, %v1523_v20  ;;  %v1683_v30 = vadd.f32 %v1682_v15, %v1681_v57  ;;  %v1673_v35 = vrot.slane %v1672_v5, 2  ;;  %v1879_v36 = vmax.f32 %v1847_v21, 0.0  ;;  %v2905_v21 = vpop.f32.mrf.mxu1 }
 0x4fb   :  { %v2420_v27 = vpop.eup %2419  ;;  %v1759_v29 = vsub.f32 %v1727_v8, %v1743_v24  ;;  %v1887_v37 = vmax.f32 %v1855_v17, 0.0  ;;  %v1881_v39 = vmax.f32 %v1849_v47, 0.0  ;;  %v1889_v44 = vmax.f32 %v1857_v25, 0.0 }
 0x4fc   :  { %v2422_v45 = vpop.eup %2421  ;;  %v1848_v51 = vmul.f32 %v2420_v27, %v1816_v26  ;;  %v1856_v9 = vmul.f32 %v2420_v27, %v1824_v28  ;;  %v1818_v52 = vsub.f32 %v2769_v10, %v2817_v40  ;;  %v893_v22 = vsub.s32 4, %v2736_v43  ;;  %v1377_v10 = vpop.f32.mrf.mxu0 }
 0x4fd   :  { %v1826_v38 = vsub.f32 %v2797_v23, %v2817_v40  ;;  %v1516_v53 = vadd.f32 %v1515_v31, %v1514_v19  ;;  %v1526_v55 = vadd.f32 %v1525_v33, %v1524_v7  ;;  %v1685_v58 = vrot.slane %v1684_v34, 4 }
 0x4fe   :  { %v1775_v60 = vmax.f32 %v1759_v29, 0.0  ;;  %v1729_v62 = vmul.f32 0.0625, %v1683_v30  ;;  %v1745_v1 = vmul.f32 %v2887_v32, %v2887_v32  ;;  %v1674_v2 = vadd.f32 %v1673_v35, %v1672_v5  ;;  %v1379_v47 = vpop.f32.mrf.mxu0 }
 0x4ff   :  { %v1911_v57 = vmax.f32 %v1879_v36, %v1887_v37  ;;  %v1925_v11 = vmax.f32 %v1881_v39, %v1889_v44  ;;  %v1850_v12 = vmul.f32 %v2422_v45, %v1818_v52  ;;  %v2896_v3 = vmul.f32 0.0625, %v1516_v53  ;;  %v1442_v36 = vpop.f32.mrf.mxu1 }
 0x500   :  { %v1880_v41 = vmax.f32 %v1848_v51, 0.0  ;;  %v1888_v4 = vmax.f32 %v1856_v9, 0.0  ;;  %v1858_v14 = vmul.f32 %v2422_v45, %v1826_v38  ;;  %v1675_v23 = vrot.slane %v1674_v2, 1  ;;  %v1381_v9 = vpop.f32.mrf.mxu0 }
 0x501   :  { %v2899_v40 = vrot.slane %v2743_v63, %v893_v22  ;;  %v901_v6 = vsub.s32 6, %v2736_v43  ;;  %v897_v18 = vsub.s32 5, %v2736_v43  ;;  %v1791_v19 = vadd.f32 1e-05, %v1775_v60 }
 0x502   :  { %v1761_v5 = vsub.f32 %v1729_v62, %v1745_v1  ;;  %v1676_v7 = vadd.f32 %v1675_v23, %v1674_v2  ;;  %v1744_v13 = vmul.f32 %v2896_v3, %v2896_v3  ;;  %v1912_v8 = vrot.slane %v1911_v57, 4 }
 0x503   :  { %v1926_v20 = vrot.slane %v1925_v11, 4  ;;  %v1527_v15 = vrot.slane %v1526_v55, 2  ;;  %v1686_v17 = vadd.f32 %v1685_v58, %v1684_v34  ;;  %v1918_v25 = vmax.f32 %v1880_v41, %v1888_v4 }
 0x504   :  { %v1882_v24 = vmax.f32 %v1850_v12, 0.0  ;;  %v1890_v26 = vmax.f32 %v1858_v14, 0.0  ;;  %v1728_v27 = vmul.f32 0.0625, %v1676_v7  ;;  %v2908_v33 = vrot.slane %v2743_v63, %v901_v6 }
 0x505   :  { %v1528_v28 = vadd.f32 %v1527_v15, %v1526_v55  ;;  %v1687_v31 = vrot.slane %v1686_v17, 2  ;;  %v2911_v29 = vrot.slane %v2743_v63, %v897_v18  ;;  %2423 = vrsqrt.f32 %v1791_v19 }
 0x506   :  { %v1777_v30 = vmax.f32 %v1761_v5, 0.0  ;;  %v1760_v35 = vsub.f32 %v1728_v27, %v1744_v13  ;;  %v2564_v37 = vmov 1983009808   ;;  %v1913_v34 = vmax.f32 %v1911_v57, %v1912_v8 }
 0x507   :  { %v2913_v39 = vunpack.c.l.s4 %v2564_v37  ;;  %v1529_v44 = vrot.slane %v1528_v28, 1  ;;  %v1688_v45 = vadd.f32 %v1687_v31, %v1686_v17  ;;  %v2916_v51 = vadd.f32 %v1375_v46, %v2899_v40 }
 0x508   :  { %v1927_v52 = vmax.f32 %v1925_v11, %v1926_v20  ;;  %v1919_v22 = vrot.slane %v1918_v25, 4  ;;  %v1932_v38 = vmax.f32 %v1882_v24, %v1890_v26  ;;  %v1776_v53 = vmax.f32 %v1760_v35, 0.0 }
 0x509   :  { %v1530_v55 = vadd.f32 %v1529_v44, %v1528_v28  ;;  %v1689_v58 = vrot.slane %v1688_v45, 1  ;;  %v2919_v60 = vadd.f32 %v1379_v47, %v2899_v40  ;;  %v2922_v62 = vadd.f32 %v1442_v36, %v2908_v33 }
 0x50a   :  { %v1793_v1 = vadd.f32 1e-05, %v1777_v30  ;;  %v1792_v2 = vadd.f32 1e-05, %v1776_v53  ;;  %v2925_v57 = vadd.f32 %v1438_v0, %v2908_v33  ;;  %v2928_v46 = vadd.f32 %v1381_v9, %v2911_v29 }
 0x50b   :  { %v2930_v11 = vmul.f32 0.0625, %v1530_v55  ;;  %v1690_v12 = vadd.f32 %v1689_v58, %v1688_v45  ;;  %v1475_v41 = vadd.f32 %v2919_v60, %v2916_v51  ;;  %v1587_v4 = vmul.f32 %v2919_v60, %v2919_v60 }
 0x50c   :  { %v1933_v14 = vrot.slane %v1932_v38, 4  ;;  %v1579_v23 = vmul.f32 %v2916_v51, %v2916_v51  ;;  %v1545_v0 = vadd.f32 %v2922_v62, %v2925_v57  ;;  %v1605_v6 = vmul.f32 %v2922_v62, %v2922_v62 }
 0x50d   :  { %2425 = vrsqrt.f32 %v1792_v2  ;;  %v1730_v18 = vmul.f32 0.0625, %v1690_v12  ;;  %v1746_v19 = vmul.f32 %v2930_v11, %v2930_v11  ;;  %v2945_v5 = vadd.f32 %v1377_v10, %v2911_v29 }
 0x50e   :  { %v1914_v7 = vrot.slane %v1913_v34, 2  ;;  %v1597_v13 = vmul.f32 %v2925_v57, %v2925_v57  ;;  %v1476_v8 = vrot.slane %v1475_v41, 4  ;;  %v1635_v20 = vadd.f32 %v1587_v4, %v1579_v23 }
 0x50f   :  { %2427 = vrsqrt.f32 %v1793_v1  ;;  %v1762_v15 = vsub.f32 %v1730_v18, %v1746_v19  ;;  %v1546_v17 = vrot.slane %v1545_v0, 4  ;;  %v1482_v47 = vadd.f32 %v2928_v46, %v2945_v5 }
 0x510   :  { %v1928_v24 = vrot.slane %v1927_v52, 2  ;;  %v1477_v26 = vadd.f32 %v1476_v8, %v1475_v41  ;;  %v1636_v27 = vrot.slane %v1635_v20, 4  ;;  %v1705_v28 = vadd.f32 %v1605_v6, %v1597_v13 }
 0x511   :  { %v1920_v31 = vmax.f32 %v1918_v25, %v1919_v22  ;;  %v1934_v30 = vmax.f32 %v1932_v38, %v1933_v14  ;;  %v1778_v10 = vmax.f32 %v1762_v15, 0.0  ;;  %v1547_v35 = vadd.f32 %v1546_v17, %v1545_v0 }
 0x512   :  { %v1831_v36 = vsub.f32 %v2824_v61, %v2875_v16  ;;  %v1839_v37 = vsub.f32 %v2830_v56, %v2875_v16  ;;  %v905_v44 = vsub.s32 7, %v2736_v43  ;;  %v2043_v45 = vunpack.c.0.s8 %v2913_v39  ;;  %v2424_v9 = vpop.eup %2423 }
 0x513   :  { %v1915_v53 = vmax.f32 %v1913_v34, %v1914_v7  ;;  %v1794_v55 = vadd.f32 1e-05, %v1778_v10  ;;  %v1706_v58 = vrot.slane %v1705_v28, 4  ;;  %v1483_v1 = vrot.slane %v1482_v47, 4 }
 0x514   :  { %v1478_v2 = vrot.slane %v1477_v26, 2  ;;  %v1637_v25 = vadd.f32 %v1636_v27, %v1635_v20  ;;  %v1548_v22 = vrot.slane %v1547_v35, 2  ;;  %v1588_v38 = vmul.f32 %v2928_v46, %v2928_v46 }
 0x515   :  { %v1929_v12 = vmax.f32 %v1927_v52, %v1928_v24  ;;  %v1921_v61 = vrot.slane %v1920_v31, 2  ;;  %v1935_v41 = vrot.slane %v1934_v30, 2  ;;  %v1707_v4 = vadd.f32 %v1706_v58, %v1705_v28 }
 0x516   :  { %v1863_v56 = vmul.f32 %v2424_v9, %v1831_v36  ;;  %v1871_v16 = vmul.f32 %v2424_v9, %v1839_v37  ;;  %2429 = vrsqrt.f32 %v1794_v55  ;;  %v1580_v39 = vmul.f32 %v2945_v5, %v2945_v5 }
 0x517   :  { %v1916_v34 = vrot.slane %v1915_v53, 1  ;;  %v2962_v14 = vrot.slane %v2743_v63, %v905_v44  ;;  %v1484_v23 = vadd.f32 %v1483_v1, %v1482_v47  ;;  %v2965_v0 = vsub.s32 %v2043_v45, %v2736_v43  ;;  %v1444_v43 = vpop.f32.mrf.mxu1 }
 0x518   :  { %v1479_v6 = vadd.f32 %v1478_v2, %v1477_v26  ;;  %v1638_v18 = vrot.slane %v1637_v25, 2  ;;  %v1549_v52 = vadd.f32 %v1548_v22, %v1547_v35  ;;  %v1642_v19 = vadd.f32 %v1588_v38, %v1580_v39 }
 0x519   :  { %v1930_v7 = vrot.slane %v1929_v12, 1  ;;  %v1833_v13 = vsub.f32 %v2827_v50, %v2887_v32  ;;  %v1841_v8 = vsub.f32 %v2833_v59, %v2887_v32  ;;  %v1708_v20 = vrot.slane %v1707_v4, 2 }
 0x51a   :  { %v2426_v15 = vpop.eup %2425  ;;  %v1922_v17 = vmax.f32 %v1920_v31, %v1921_v61  ;;  %v2971_v63 = vmax.f32 %v1934_v30, %v1935_v41  ;;  %v1895_v47 = vmax.f32 %v1863_v56, 0.0  ;;  %v1903_v24 = vmax.f32 %v1871_v16, 0.0  ;;  %v1385_v31 = vpop.f32.mrf.mxu0 }
 0x51b   :  { %v2973_v27 = vmax.f32 %v1915_v53, %v1916_v34  ;;  %v1832_v26 = vsub.f32 %v2840_v48, %v2896_v3  ;;  %v1840_v28 = vsub.f32 %v2843_v49, %v2896_v3  ;;  %v1485_v50 = vrot.slane %v1484_v23, 2 }
 0x51c   :  { %v2428_v10 = vpop.eup %2427  ;;  %v1480_v35 = vrot.slane %v1479_v6, 1  ;;  %v1639_v59 = vadd.f32 %v1638_v18, %v1637_v25  ;;  %v1550_v32 = vrot.slane %v1549_v52, 1  ;;  %v1643_v36 = vrot.slane %v1642_v19, 4  ;;  %v1387_v61 = vpop.f32.mrf.mxu0 }
 0x51d   :  { %v1864_v30 = vmul.f32 %v2426_v15, %v1832_v26  ;;  %v1872_v37 = vmul.f32 %v2426_v15, %v1840_v28  ;;  %v1709_v44 = vadd.f32 %v1708_v20, %v1707_v4  ;;  %v2980_v45 = vadd.f32 %v1444_v43, %v2962_v14 }
 0x51e   :  { %v2982_v9 = vmax.f32 %v1929_v12, %v1930_v7  ;;  %v1923_v53 = vrot.slane %v1922_v17, 1  ;;  %v1937_v48 = vrot.slane %v2971_v63, 1  ;;  %v1967_v55 = vmax.f32 %v1895_v47, %v1903_v24  ;;  %v1389_v15 = vpop.f32.mrf.mxu0 }
 0x51f   :  { %v1865_v49 = vmul.f32 %v2428_v10, %v1833_v13  ;;  %v1873_v3 = vmul.f32 %v2428_v10, %v1841_v8  ;;  %v2987_v58 = vadd.f32 %v2905_v21, %v2962_v14  ;;  %v1486_v1 = vadd.f32 %v1485_v50, %v1484_v23 }
 0x520   :  { %v1481_v2 = vadd.f32 %v1480_v35, %v1479_v6  ;;  %v1640_v25 = vrot.slane %v1639_v59, 1  ;;  %v1551_v22 = vadd.f32 %v1550_v32, %v1549_v52  ;;  %v1644_v38 = vadd.f32 %v1643_v36, %v1642_v19 }
 0x521   :  { %v1896_v41 = vmax.f32 %v1864_v30, 0.0  ;;  %v1904_v4 = vmax.f32 %v1872_v37, 0.0  ;;  %v1710_v12 = vrot.slane %v1709_v44, 1  ;;  %v1552_v56 = vadd.f32 %v2980_v45, %v2987_v58  ;;  %v1391_v37 = vpop.f32.mrf.mxu0 }
 0x522   :  { %v2991_v16 = vmax.f32 %v1922_v17, %v1923_v53  ;;  %v1968_v39 = vrot.slane %v1967_v55, 4  ;;  %v1834_v34 = vsub.f32 %v2860_v54, %v2930_v11  ;;  %v1842_v21 = vsub.f32 %v2863_v42, %v2930_v11 }
 0x523   :  { %v2430_v23 = vpop.eup %2429  ;;  %v1897_v6 = vmax.f32 %v1865_v49, 0.0  ;;  %v1905_v18 = vmax.f32 %v1873_v3, 0.0  ;;  %v1487_v52 = vrot.slane %v1486_v1, 1  ;;  %v1645_v19 = vrot.slane %v1644_v38, 2 }
 0x524   :  { %v2997_v7 = vmul.f32 0.0625, %v1481_v2  ;;  %v1641_v13 = vadd.f32 %v1640_v25, %v1639_v59  ;;  %v2999_v8 = vmul.f32 0.0625, %v1551_v22  ;;  %v1553_v20 = vrot.slane %v1552_v56, 4 }
 0x525   :  { %v1974_v17 = vmax.f32 %v1896_v41, %v1904_v4  ;;  %v1598_v47 = vmul.f32 %v2987_v58, %v2987_v58  ;;  %v1711_v54 = vadd.f32 %v1710_v12, %v1709_v44  ;;  %v1606_v42 = vmul.f32 %v2980_v45, %v2980_v45 }
 0x526   :  { %v1866_v11 = vmul.f32 %v2430_v23, %v1834_v34  ;;  %v1874_v24 = vmul.f32 %v2430_v23, %v1842_v21  ;;  %v1554_v43 = vadd.f32 %v1553_v20, %v1552_v56  ;;  %v3006_v26 = vadd.f32 %v1385_v31, %v2899_v40 }
 0x527   :  { %v3008_v28 = vmax.f32 %v1967_v55, %v1968_v39  ;;  %v1981_v50 = vmax.f32 %v1897_v6, %v1905_v18  ;;  %v1488_v10 = vadd.f32 %v1487_v52, %v1486_v1  ;;  %v1646_v35 = vadd.f32 %v1645_v19, %v1644_v38 }
 0x528   :  { %v1723_v59 = vmul.f32 0.0625, %v1641_v13  ;;  %v1739_v32 = vmul.f32 %v2997_v7, %v2997_v7  ;;  %v1749_v36 = vmul.f32 %v2999_v8, %v2999_v8  ;;  %v1555_v30 = vrot.slane %v1554_v43, 2 }
 0x529   :  { %v1975_v44 = vrot.slane %v1974_v17, 4  ;;  %v1733_v53 = vmul.f32 0.0625, %v1711_v54  ;;  %v1712_v49 = vadd.f32 %v1606_v42, %v1598_v47  ;;  %v3015_v31 = vadd.f32 %v1387_v61, %v2911_v29 }
 0x52a   :  { %v1898_v55 = vmax.f32 %v1866_v11, 0.0  ;;  %v1906_v3 = vmax.f32 %v1874_v24, 0.0  ;;  %v1556_v2 = vadd.f32 %v1555_v30, %v1554_v43  ;;  %v3018_v1 = vadd.f32 %v1389_v15, %v2899_v40 }
 0x52b   :  { %v3020_v25 = vmul.f32 0.0625, %v1488_v10  ;;  %v1647_v22 = vrot.slane %v1646_v35, 1  ;;  %v1713_v38 = vrot.slane %v1712_v49, 4  ;;  %v3023_v41 = vadd.f32 %v1391_v37, %v2911_v29 }
 0x52c   :  { %v1557_v4 = vrot.slane %v1556_v2, 1  ;;  %v1595_v12 = vmul.f32 %v3006_v26, %v3006_v26  ;;  %v1531_v61 = vadd.f32 %v3018_v1, %v3006_v26  ;;  %v1603_v56 = vmul.f32 %v3018_v1, %v3018_v1 }
 0x52d   :  { %v1714_v39 = vadd.f32 %v1713_v38, %v1712_v49  ;;  %v1596_v40 = vmul.f32 %v3015_v31, %v3015_v31  ;;  %v1538_v34 = vadd.f32 %v3023_v41, %v3015_v31  ;;  %v1604_v29 = vmul.f32 %v3023_v41, %v3023_v41 }
 0x52e   :  { %v1988_v21 = vmax.f32 %v1898_v55, %v1906_v3  ;;  %v1558_v23 = vadd.f32 %v1557_v4, %v1556_v2  ;;  %v1532_v6 = vrot.slane %v1531_v61, 4  ;;  %v1691_v18 = vadd.f32 %v1603_v56, %v1595_v12 }
 0x52f   :  { %v1648_v52 = vadd.f32 %v1647_v22, %v1646_v35  ;;  %v1715_v19 = vrot.slane %v1714_v39, 2  ;;  %v1539_v13 = vrot.slane %v1538_v34, 4  ;;  %v1698_v20 = vadd.f32 %v1604_v29, %v1596_v40 }
 0x530   :  { %v1982_v15 = vrot.slane %v1981_v50, 4  ;;  %v1755_v47 = vsub.f32 %v1723_v59, %v1739_v32  ;;  %v1533_v54 = vadd.f32 %v1532_v6, %v1531_v61  ;;  %v1692_v42 = vrot.slane %v1691_v18, 4 }
 0x531   :  { %v3037_v11 = vmul.f32 0.0625, %v1558_v23  ;;  %v1716_v24 = vadd.f32 %v1715_v19, %v1714_v39  ;;  %v1540_v43 = vadd.f32 %v1539_v13, %v1538_v34  ;;  %v1699_v10 = vrot.slane %v1698_v20, 4 }
 0x532   :  { %v3042_v30 = vmax.f32 %v2971_v63, %v1937_v48  ;;  %v1970_v37 = vrot.slane %v3008_v28, 2  ;;  %v1989_v35 = vrot.slane %v1988_v21, 4  ;;  %v1765_v49 = vsub.f32 %v1733_v53, %v1749_v36  ;;  %v1428_v48 = vpop.f32.mrf.mxu0 }
 0x533   :  { %v1976_v55 = vmax.f32 %v1974_v17, %v1975_v44  ;;  %v1724_v3 = vmul.f32 0.0625, %v1648_v52  ;;  %v1740_v59 = vmul.f32 %v3020_v25, %v3020_v25  ;;  %v1717_v32 = vrot.slane %v1716_v24, 1 }
 0x534   :  { %v1534_v2 = vrot.slane %v1533_v54, 2  ;;  %v1693_v22 = vadd.f32 %v1692_v42, %v1691_v18  ;;  %v1541_v38 = vrot.slane %v1540_v43, 2  ;;  %v1700_v4 = vadd.f32 %v1699_v10, %v1698_v20 }
 0x535   :  { %v1983_v12 = vmax.f32 %v1981_v50, %v1982_v15  ;;  %v1771_v61 = vmax.f32 %v1755_v47, 0.0  ;;  %v1718_v56 = vadd.f32 %v1717_v32, %v1716_v24  ;;  %v1750_v63 = vmul.f32 %v3037_v11, %v3037_v11  ;;  %v1430_v15 = vpop.f32.mrf.mxu0 }
 0x536   :  { %v1990_v39 = vmax.f32 %v1988_v21, %v1989_v35  ;;  %v1781_v40 = vmax.f32 %v1765_v49, 0.0  ;;  %v1535_v36 = vadd.f32 %v1534_v2, %v1533_v54  ;;  %v1694_v17 = vrot.slane %v1693_v22, 2 }
 0x537   :  { %v1756_v44 = vsub.f32 %v1724_v3, %v1740_v59  ;;  %v1734_v53 = vmul.f32 0.0625, %v1718_v56  ;;  %v1542_v34 = vadd.f32 %v1541_v38, %v1540_v43  ;;  %v1701_v29 = vrot.slane %v1700_v4, 2 }
 0x538   :  { %v1971_v23 = vmax.f32 %v3008_v28, %v1970_v37  ;;  %v1977_v6 = vrot.slane %v1976_v55, 2  ;;  %v1536_v18 = vrot.slane %v1535_v36, 1  ;;  %v1695_v52 = vadd.f32 %v1694_v17, %v1693_v22  ;;  %v1432_v22 = vpop.f32.mrf.mxu0 }
 0x539   :  { %v1787_v50 = vadd.f32 1e-05, %v1771_v61  ;;  %v1766_v19 = vsub.f32 %v1734_v53, %v1750_v63  ;;  %v1543_v13 = vrot.slane %v1542_v34, 1  ;;  %v1702_v20 = vadd.f32 %v1701_v29, %v1700_v4 }
 0x53a   :  { %v1984_v47 = vrot.slane %v1983_v12, 2  ;;  %v1991_v42 = vrot.slane %v1990_v39, 2  ;;  %v1537_v21 = vadd.f32 %v1536_v18, %v1535_v36  ;;  %v1696_v24 = vrot.slane %v1695_v52, 1 }
 0x53b   :  { %v1797_v54 = vadd.f32 1e-05, %v1781_v40  ;;  %v1772_v10 = vmax.f32 %v1756_v44, 0.0  ;;  %v1544_v35 = vadd.f32 %v1543_v13, %v1542_v34  ;;  %v1703_v49 = vrot.slane %v1702_v20, 1 }
 0x53c   :  { %v1978_v43 = vmax.f32 %v1976_v55, %v1977_v6  ;;  %v1782_v3 = vmax.f32 %v1766_v19, 0.0  ;;  %v3050_v59 = vmul.f32 0.0625, %v1537_v21  ;;  %v1697_v28 = vadd.f32 %v1696_v24, %v1695_v52 }
 0x53d   :  { %v1972_v37 = vrot.slane %v1971_v23, 1  ;;  %2431 = vrsqrt.f32 %v1787_v50  ;;  %v3052_v32 = vmul.f32 0.0625, %v1544_v35  ;;  %v1704_v2 = vadd.f32 %v1703_v49, %v1702_v20 }
 0x53e   :  { %v2039_v38 = vcombine.low %v2973_v27, %v2991_v16  ;;  %v1992_v4 = vmax.f32 %v1990_v39, %v1991_v42  ;;  %v1731_v61 = vmul.f32 0.0625, %v1697_v28  ;;  %v1747_v56 = vmul.f32 %v3050_v59, %v3050_v59 }
 0x53f   :  { %v1985_v63 = vmax.f32 %v1983_v12, %v1984_v47  ;;  %2433 = vrsqrt.f32 %v1797_v54  ;;  %v1788_v55 = vadd.f32 1e-05, %v1772_v10  ;;  %v1732_v40 = vmul.f32 0.0625, %v1704_v2  ;;  %v1434_v12 = vpop.f32.mrf.mxu0 }
 0x540   :  { %v2040_v36 = vcombine.low %v2982_v9, %v3042_v30  ;;  %v1979_v17 = vrot.slane %v1978_v43, 1  ;;  %v1798_v44 = vadd.f32 1e-05, %v1782_v3  ;;  %v1763_v53 = vsub.f32 %v1731_v61, %v1747_v56 }
 0x541   :  { %v1973_v34 = vmax.f32 %v1971_v23, %v1972_v37  ;;  %v1819_v29 = vsub.f32 %v2916_v51, %v2997_v7  ;;  %v1748_v39 = vmul.f32 %v3052_v32, %v3052_v32  ;;  %v3065_v6 = vadd.f32 %v1428_v48, %v2908_v33 }
 0x542   :  { %v1993_v18 = vrot.slane %v1992_v4, 1  ;;  %v1827_v52 = vsub.f32 %v2919_v60, %v2997_v7  ;;  %v1779_v50 = vmax.f32 %v1763_v53, 0.0  ;;  %v3070_v19 = vadd.f32 %v1430_v15, %v2962_v14 }
 0x543   :  { %v1986_v13 = vrot.slane %v1985_v63, 1  ;;  %2435 = vrsqrt.f32 %v1788_v55  ;;  %v1764_v23 = vsub.f32 %v1732_v40, %v1748_v39  ;;  %v3073_v51 = vadd.f32 %v1432_v22, %v2908_v33 }
 0x544   :  { %v1980_v20 = vmax.f32 %v1978_v43, %v1979_v17  ;;  %2437 = vrsqrt.f32 %v1798_v44  ;;  %v1795_v47 = vadd.f32 1e-05, %v1779_v50  ;;  %v3076_v48 = vadd.f32 %v1434_v12, %v2962_v14 }
 0x545   :  { %v1780_v42 = vmax.f32 %v1764_v23, 0.0  ;;  %v1581_v60 = vmul.f32 %v3065_v6, %v3065_v6  ;;  %v1489_v7 = vadd.f32 %v3073_v51, %v3065_v6  ;;  %v1589_v15 = vmul.f32 %v3073_v51, %v3073_v51 }
 0x546   :  { %v1994_v21 = vmax.f32 %v1992_v4, %v1993_v18  ;;  %2439 = vrsqrt.f32 %v1795_v47  ;;  %v1582_v33 = vmul.f32 %v3070_v19, %v3070_v19  ;;  %v1496_v24 = vadd.f32 %v3076_v48, %v3070_v19 }
 0x547   :  { %v1796_v14 = vadd.f32 1e-05, %v1780_v42  ;;  %v1490_v54 = vrot.slane %v1489_v7, 4  ;;  %v1649_v10 = vadd.f32 %v1589_v15, %v1581_v60  ;;  %v1590_v35 = vmul.f32 %v3076_v48, %v3076_v48 }
 0x548   :  { %v1987_v49 = vmax.f32 %v1985_v63, %v1986_v13  ;;  %v1837_v43 = vsub.f32 %v2925_v57, %v2999_v8  ;;  %v1497_v3 = vrot.slane %v1496_v24, 4  ;;  %v2073_v28 = vcombine.low %v1973_v34, %v1980_v20 }
 0x549   :  { %2441 = vrsqrt.f32 %v1796_v14  ;;  %v1491_v37 = vadd.f32 %v1490_v54, %v1489_v7  ;;  %v1650_v2 = vrot.slane %v1649_v10, 4  ;;  %v1656_v22 = vadd.f32 %v1590_v35, %v1582_v33 }
 0x54a   :  { %v2432_v4 = vpop.eup %2431  ;;  %v1845_v61 = vsub.f32 %v2922_v62, %v2999_v8  ;;  %v1820_v56 = vsub.f32 %v2945_v5, %v3020_v25  ;;  %v1498_v55 = vadd.f32 %v1497_v3, %v1496_v24  ;;  %v2074_v40 = vcombine.low %v1987_v49, %v1994_v21 }
 0x54b   :  { %v1492_v17 = vrot.slane %v1491_v37, 2  ;;  %v1651_v63 = vadd.f32 %v1650_v2, %v1649_v10  ;;  %v1657_v44 = vrot.slane %v1656_v22, 4  ;;  %v2081_v57 = vrot.slane %v2073_v28, %v2965_v0 }
 0x54c   :  { %v2434_v53 = vpop.eup %2433  ;;  %v1828_v34 = vsub.f32 %v2928_v46, %v3020_v25  ;;  %v1838_v39 = vsub.f32 %v2987_v58, %v3037_v11  ;;  %v1499_v12 = vrot.slane %v1498_v55, 2  ;;  %v2088_v62 = vrot.slane %v2074_v40, %v2965_v0 }
 0x54d   :  { %v3102_v8 = vmul.f32 %v2432_v4, %v1819_v29  ;;  %v1846_v5 = vsub.f32 %v2980_v45, %v3037_v11  ;;  %v1493_v18 = vadd.f32 %v1492_v17, %v1491_v37  ;;  %v1652_v50 = vrot.slane %v1651_v63, 2 }
 0x54e   :  { %v3106_v13 = vmul.f32 %v2432_v4, %v1827_v52  ;;  %v1500_v23 = vadd.f32 %v1499_v12, %v1498_v55  ;;  %v1658_v20 = vadd.f32 %v1657_v44, %v1656_v22  ;;  %v2089_v47 = vcombine.low %v2081_v57, %v2088_v62 }
 0x54f   :  { %v3108_v42 = vmul.f32 %v2434_v53, %v1837_v43  ;;  %v3110_v46 = vmul.f32 %v2434_v53, %v1845_v61  ;;  %v1494_v58 = vrot.slane %v1493_v18, 1  ;;  %v1653_v25 = vadd.f32 %v1652_v50, %v1651_v63 }
 0x550   :  { %v2436_v60 = vpop.eup %2435  ;;  %v1501_v7 = vrot.slane %v1500_v23, 1  ;;  %v1659_v29 = vrot.slane %v1658_v20, 2  ;;  %v2047_v45 = vrot.slane %v2039_v38, %v2965_v0  ;;  %v2054_v11 = vrot.slane %v2040_v36, %v2965_v0 }
 0x551   :  { %v2438_v52 = vpop.eup %2437  ;;  %v1835_v15 = vsub.f32 %v3006_v26, %v3050_v59  ;;  %v1843_v21 = vsub.f32 %v3018_v1, %v3050_v59  ;;  %v1495_v33 = vadd.f32 %v1494_v58, %v1493_v18  ;;  %v1654_v24 = vrot.slane %v1653_v25, 1 }
 0x552   :  { %v1836_v14 = vsub.f32 %v3015_v31, %v3052_v32  ;;  %v1502_v54 = vadd.f32 %v1501_v7, %v1500_v23  ;;  %v1660_v27 = vadd.f32 %v1659_v29, %v1658_v20  ;;  %v2111_v16 = vrot.slane %v2089_v47, 7 }
 0x553   :  { %v2440_v38 = vpop.eup %2439  ;;  %v1844_v9 = vsub.f32 %v3023_v41, %v3052_v32  ;;  %v3128_v30 = vmul.f32 0.0625, %v1495_v33  ;;  %v1655_v36 = vadd.f32 %v1654_v24, %v1653_v25  ;;  %v1870_v26 = vmul.f32 %v2438_v52, %v1838_v39 }
 0x554   :  { %v3130_v10 = vmul.f32 0.0625, %v1502_v54  ;;  %v1661_v1 = vrot.slane %v1660_v27, 1  ;;  %v2055_v59 = vcombine.low %v2047_v45, %v2054_v11  ;;  %v1878_v35 = vmul.f32 %v2438_v52, %v1846_v5 }
 0x555   :  { %v1725_v49 = vmul.f32 0.0625, %v1655_v36  ;;  %v1741_v31 = vmul.f32 %v3128_v30, %v3128_v30  ;;  %v1867_v3 = vmul.f32 %v2440_v38, %v1835_v15  ;;  %v1875_v28 = vmul.f32 %v2440_v38, %v1843_v21 }
 0x556   :  { %v2442_v43 = vpop.eup %2441  ;;  %v1662_v37 = vadd.f32 %v1661_v1, %v1660_v27  ;;  %v2113_v41 = vsel %vm2112_vm2, %v2111_v16, %v2055_v59  ;;  %v1852_v32 = vmul.f32 %v2436_v60, %v1820_v56  ;;  %v1860_v61 = vmul.f32 %v2436_v60, %v1828_v34 }
 0x557   :  { %v1868_v2 = vmul.f32 %v2442_v43, %v1836_v14  ;;  %v1876_v22 = vmul.f32 %v2442_v43, %v1844_v9  ;;  %v1757_v4 = vsub.f32 %v1725_v49, %v1741_v31  ;;  %v1902_v55 = vmax.f32 %v1870_v26, 0.0 }
 0x558   :  { %v1726_v40 = vmul.f32 0.0625, %v1662_v37  ;;  %v1742_v17 = vmul.f32 %v3130_v10, %v3130_v10  ;;  %v2115_v53 = vsel %vm2114_vm3, %v2111_v16, %v2113_v41  ;;  %v1910_v39 = vmax.f32 %v1878_v35, 0.0 }
 0x559   :  { %v1900_v63 = vmax.f32 %v1868_v2, 0.0  ;;  %v1908_v44 = vmax.f32 %v1876_v22, 0.0  ;;  %v1773_v57 = vmax.f32 %v1757_v4, 0.0  ;;  %v1899_v12 = vmax.f32 %v1867_v3, 0.0 }
 0x55a   :  { %v1907_v62 = vmax.f32 %v1875_v28, 0.0  ;;  %v1758_v5 = vsub.f32 %v1726_v40, %v1742_v17  ;;  %v1901_v56 = vmax.f32 %v3108_v42, 0.0  ;;  %v1909_v18 = vmax.f32 %v3110_v46, 0.0 }
 0x55b   :  { %v1789_v50 = vadd.f32 1e-05, %v1773_v57  ;;  %v2002_v34 = vmax.f32 %v1900_v63, %v1908_v44  ;;  %v2117_v20 = vsel %vm2116_vm4, %v2111_v16, %v2115_v53  ;;  %v1884_v47 = vmax.f32 %v1852_v32, 0.0 }
 0x55c   :  { %v1774_v23 = vmax.f32 %v1758_v5, 0.0  ;;  %v1892_v58 = vmax.f32 %v1860_v61, 0.0  ;;  %v2119_v25 = vsel %vm2118_vm5, %v2111_v16, %v2117_v20  ;;  %v2016_v60 = vmax.f32 %v1902_v55, %v1910_v39 }
 0x55d   :  { %2443 = vrsqrt.f32 %v1789_v50  ;;  %v1995_v7 = vmax.f32 %v1899_v12, %v1907_v62  ;;  %2129 = vst [vmem:[#allocation10] sm:$0xff] %v2119_v25  ;;  %v1883_v42 = vmax.f32 %v3102_v8, 0.0  ;;  %v1891_v46 = vmax.f32 %v3106_v13, 0.0 }
 0x55e   :  { %v1790_v29 = vadd.f32 1e-05, %v1774_v23  ;;  %v2009_v45 = vmax.f32 %v1901_v56, %v1909_v18  ;;  %v2003_v11 = vrot.slane %v2002_v34, 4  ;;  %v1946_v52 = vmax.f32 %v1884_v47, %v1892_v58 }
 0x55f   :  { %v2017_v15 = vrot.slane %v2016_v60, 4  ;;  %v1996_v21 = vrot.slane %v1995_v7, 4  ;;  %v1939_v33 = vmax.f32 %v1883_v42, %v1891_v46  ;;  %v1821_v8 = vsub.f32 %v3065_v6, %v3128_v30 }
 0x560   :  { %2445 = vrsqrt.f32 %v1790_v29  ;;  %v2010_v24 = vrot.slane %v2009_v45, 4  ;;  %v2004_v14 = vmax.f32 %v2002_v34, %v2003_v11  ;;  %v1947_v54 = vrot.slane %v1946_v52, 4 }
 0x561   :  { %v2018_v27 = vmax.f32 %v2016_v60, %v2017_v15  ;;  %v1997_v16 = vmax.f32 %v1995_v7, %v1996_v21  ;;  %v1940_v38 = vrot.slane %v1939_v33, 4  ;;  %v1829_v13 = vsub.f32 %v3073_v51, %v3128_v30 }
 0x562   :  { %v2011_v9 = vmax.f32 %v2009_v45, %v2010_v24  ;;  %v2005_v36 = vrot.slane %v2004_v14, 2  ;;  %v1948_v26 = vmax.f32 %v1946_v52, %v1947_v54  ;;  %v1822_v37 = vsub.f32 %v3070_v19, %v3130_v10 }
 0x563   :  { %v2019_v59 = vrot.slane %v2018_v27, 2  ;;  %v1998_v35 = vrot.slane %v1997_v16, 2  ;;  %v1941_v49 = vmax.f32 %v1939_v33, %v1940_v38  ;;  %v1830_v41 = vsub.f32 %v3076_v48, %v3130_v10 }
 0x564   :  { %v2012_v3 = vrot.slane %v2011_v9, 2  ;;  %v2006_v28 = vmax.f32 %v2004_v14, %v2005_v36  ;;  %v1949_v2 = vrot.slane %v1948_v26, 2 }
 0x565   :  { %v2020_v4 = vmax.f32 %v2018_v27, %v2019_v59  ;;  %v1999_v51 = vmax.f32 %v1997_v16, %v1998_v35  ;;  %v1942_v55 = vrot.slane %v1941_v49, 2 }
 0x566   :  { %v2013_v17 = vmax.f32 %v2011_v9, %v2012_v3  ;;  %v2007_v63 = vrot.slane %v2006_v28, 1  ;;  %v1950_v39 = vmax.f32 %v1948_v26, %v1949_v2 }
 0x567   :  { %v2021_v19 = vrot.slane %v2020_v4, 1  ;;  %v2000_v12 = vrot.slane %v1999_v51, 1  ;;  %v1943_v10 = vmax.f32 %v1941_v49, %v1942_v55 }
 0x568   :  { %v2014_v5 = vrot.slane %v2013_v17, 1  ;;  %v2008_v56 = vmax.f32 %v2006_v28, %v2007_v63  ;;  %v1951_v34 = vrot.slane %v1950_v39, 1 }
 0x569   :  { %v2022_v23 = vmax.f32 %v2020_v4, %v2021_v19  ;;  %v2001_v20 = vmax.f32 %v1999_v51, %v2000_v12  ;;  %v1944_v25 = vrot.slane %v1943_v10, 1 }
 0x56a   :  { %v2444_v1 = vpop.eup %2443  ;;  %v2015_v60 = vmax.f32 %v2013_v17, %v2014_v5  ;;  %v1952_v42 = vmax.f32 %v1950_v39, %v1951_v34 }
 0x56b   :  { %v1853_v31 = vmul.f32 %v2444_v1, %v1821_v8  ;;  %v1861_v43 = vmul.f32 %v2444_v1, %v1829_v13  ;;  %v2090_v29 = vcombine.low %v2001_v20, %v2008_v56  ;;  %v1945_v52 = vmax.f32 %v1943_v10, %v1944_v25 }
 0x56c   :  { %v2091_v11 = vcombine.low %v2015_v60, %v2022_v23 }
 0x56d   :  { %v2446_v32 = vpop.eup %2445  ;;  %v1885_v6 = vmax.f32 %v1853_v31, 0.0  ;;  %v1893_v22 = vmax.f32 %v1861_v43, 0.0  ;;  %v2098_v21 = vrot.slane %v2090_v29, %v2965_v0  ;;  %v2056_v33 = vcombine.low %v1945_v52, %v1952_v42 }
 0x56e   :  { %v1854_v30 = vmul.f32 %v2446_v32, %v1822_v37  ;;  %v1862_v61 = vmul.f32 %v2446_v32, %v1830_v41  ;;  %v2105_v54 = vrot.slane %v2091_v11, %v2965_v0 }
 0x56f   :  { %v1953_v40 = vmax.f32 %v1885_v6, %v1893_v22  ;;  %v2064_v38 = vrot.slane %v2056_v33, %v2965_v0 }
 0x570   :  { %v1886_v44 = vmax.f32 %v1854_v30, 0.0  ;;  %v1894_v57 = vmax.f32 %v1862_v61, 0.0  ;;  %v2106_v16 = vcombine.low %v2098_v21, %v2105_v54 }
 0x571   :  { %v1954_v53 = vrot.slane %v1953_v40, 4 }
 0x572   :  { %v1960_v62 = vmax.f32 %v1886_v44, %v1894_v57  ;;  %v2122_v26 = vrot.slane %v2106_v16, 7 }
 0x573   :  { %v1955_v48 = vmax.f32 %v1953_v40, %v1954_v53 }
 0x574   :  { %v1961_v18 = vrot.slane %v1960_v62, 4 }
 0x575   :  { %v1956_v50 = vrot.slane %v1955_v48, 2 }
 0x576   :  { %v1962_v47 = vmax.f32 %v1960_v62, %v1961_v18 }
 0x577   :  { %v1957_v58 = vmax.f32 %v1955_v48, %v1956_v50 }
 0x578   :  { %v1963_v7 = vrot.slane %v1962_v47, 2 }
 0x579   :  { %v1958_v46 = vrot.slane %v1957_v58, 1 }
 0x57a   :  { %v1964_v45 = vmax.f32 %v1962_v47, %v1963_v7 }
 0x57b   :  { %v1959_v24 = vmax.f32 %v1957_v58, %v1958_v46 }
 0x57c   :  { %v1965_v15 = vrot.slane %v1964_v45, 1 }
 0x57e   :  { %v1966_v14 = vmax.f32 %v1964_v45, %v1965_v15 }
 0x580   :  { %v2057_v27 = vcombine.low %v1959_v24, %v1966_v14 }
 0x582   :  { %v2071_v9 = vrot.slane %v2057_v27, %v2965_v0 }
 0x584   :  { %v2072_v36 = vcombine.low %v2064_v38, %v2071_v9 }
 0x586   :  { %v2123_v8 = vsel %vm2112_vm2, %v2122_v26, %v2072_v36 }
 0x587   :  { %v2124_v13 = vsel %vm2114_vm3, %v2122_v26, %v2123_v8 }
 0x588   :  { %v2125_v1 = vsel %vm2116_vm4, %v2122_v26, %v2124_v13 }
 0x589   :  { %v2126_v59 = vsel %vm2118_vm5, %v2122_v26, %v2125_v1 }
 0x58a   :  { %2130 = vst [vmem:[#allocation10 + $0x8] sm:$0xff] %v2126_v59 }
 0x58b   :  { %2538 = shalt.err (!%p2535_p10)
}
 0x58c   :  { %2140 = dma.vmem_to_hbm [thread:$0]  %s2138_s13, 256, %s3174_s11, [#allocation4]  }
 0x58d   :  { %2553 = dma.done.wait [#allocation4], 256  }
 0x58e   :  { %2554 = vsyncadd [#allocation4], 4294967040 }
 0x58f   :  { %2144 = vsyncpa [#allocation3], 1 }
 0x590   :  { %2145 = vsyncpa [#allocation6], 1 }
 0x591   :  { %2146 = vsyncpa [#allocation9], 1 }
 0x592   :  { %2147 = vsyncpa [#allocation4], 1 }

</bundles_post_ra>
